<compile_context>
chip_gen: v7x
topology: tpu7x:2x2x1
jax: 0.10.0
libtpu: 0.0.40
codegen_flags: <defaults>
</compile_context>

<pallas_src>
import jax
import jax.numpy as jnp
from jax.experimental import pallas as pl
from jax.experimental.pallas import tpu as pltpu


def _round_up(x, m):
    return -(-x // m) * m


def _pick_cp_chunk(Cp, s, H, W, itemsize, budget_bytes=8 * 1024 * 1024):
    """Largest divisor of Cp whose double-buffered in+out blocks fit the budget.

    ~1-2 MiB per block is already in the >=85%-of-roofline regime; keeping the
    chunk modest bounds VMEM pressure (v7x has only 64 MiB physical VMEM).
    """
    lane_out = _round_up(s * s * W, 128)
    w_in_pad = _round_up(W, 128)
    h_in_pad = _round_up(H, 8)

    def step_bytes(cpt):
        in_b = s * s * cpt * h_in_pad * w_in_pad * itemsize
        out_b = _round_up(cpt * H, 8) * lane_out * itemsize
        return 2 * (in_b + out_b)  # x2: input and output are each double-buffered

    for d in range(Cp, 0, -1):
        if Cp % d:
            continue
        if d != Cp and (d * H) % 8:
            continue  # keep the (8,128) rule on the output block's sublane dim
        if step_bytes(d) <= budget_bytes:
            return d
    return Cp  # tiny shapes land on Cp immediately; fallback for odd shapes


def _make_expand_kernel(s, Cpt, H, W):
    def expand_kernel(x_ref, o_ref):
        # x_ref block: (1, s, s, Cpt, H, W)
        # o_ref block: (1, Cpt*H, s*s*W)   flat, lane-dense view of (Cpt, H*s, W*s)
        #   flat row  = c*H + h
        #   flat lane = i*W*s + w*s + j
        for i in range(s):  # static unroll over the H-phase
            xi = x_ref[0, i]                        # (s, Cpt, H, W)   (axis 0 = j)
            yi = jnp.transpose(xi, (1, 2, 3, 0))    # (Cpt, H, W, s)   j -> minor
            yi = yi.reshape(Cpt * H, W * s)         # lane index = w*s + j
            o_ref[0, :, i * W * s:(i + 1) * W * s] = yi
    return expand_kernel


def expand(x, gain=2):
    """Pallas equivalent of Expand.forward. x: (N, C, H, W) -> (N, C/s^2, H*s, W*s)."""
    N, C, H, W = x.shape
    s = gain
    assert C % (s * s) == 0, "C must be divisible by gain**2"
    Cp = C // (s * s)
    itemsize = jnp.dtype(x.dtype).itemsize

    # Free reshape: reinterpret channels as (i, j, c').
    xr = x.reshape(N, s, s, Cp, H, W)

    Cpt = _pick_cp_chunk(Cp, s, H, W, itemsize)
    n_cp = Cp // Cpt

    kernel = _make_expand_kernel(s, Cpt, H, W)

    out_flat = pl.pallas_call(
        kernel,
        out_shape=jax.ShapeDtypeStruct((N, Cp * H, s * s * W), x.dtype),
        grid=(N, n_cp),
        in_specs=[
            pl.BlockSpec(
                (1, s, s, Cpt, H, W),
                lambda n, c: (n, 0, 0, c, 0, 0),
            )
        ],
        out_specs=pl.BlockSpec(
            (1, Cpt * H, s * s * W),
            lambda n, c: (n, c, 0),
        ),
        compiler_params=pltpu.CompilerParams(
            dimension_semantics=("parallel", "parallel"),
            vmem_limit_bytes=32 * 1024 * 1024,
        ),
        cost_estimate=pl.CostEstimate(
            flops=0,
            transcendentals=0,
            bytes_accessed=2 * x.size * itemsize,
        ),
    )(xr)

    # Free reshape: (N, Cp*H, s*s*W) and (N, Cp, H*s, W*s) share the same
    # row-major byte order.
    return out_flat.reshape(N, Cp, H * s, W * s)


def expand_ref(x, gain=2):
    """Pure-JAX reference mirroring the PyTorch forward exactly."""
    N, C, H, W = x.shape
    s = gain
    Cp = C // (s * s)
    x = x.reshape(N, s, s, Cp, H, W)
    x = jnp.transpose(x, (0, 3, 4, 1, 5, 2))
    return x.reshape(N, Cp, H * s, W * s)


if __name__ == "__main__":
    key = jax.random.PRNGKey(0)
    N, C, H, W = 2, 4, 16, 16  # gain=2 -> output (2, 1, 32, 32)
    x = jax.random.normal(key, (N, C, H, W), dtype=jnp.float32)

    out = expand(x, gain=2)
    out = jax.block_until_ready(out)

    ref = expand_ref(x, gain=2)
    assert out.shape == ref.shape == (N, C // 4, H * 2, W * 2)
    assert out.dtype == ref.dtype
    assert jnp.array_equal(out, ref)

    print("KERNEL_OK")
</pallas_src>

<mosaic_0001>
module attributes {stable_mosaic.version = 11 : i64} {
  func.func @expand_kernel(%arg0: i32, %arg1: i32, %arg2: memref<1x2x2x1x16x16xf32, #tpu.memory_space<vmem>>, %arg3: memref<1x16x64xf32, #tpu.memory_space<vmem>>) attributes {dimension_semantics = [#tpu.dimension_semantics<parallel>, #tpu.dimension_semantics<parallel>], iteration_bounds = array<i64: 2, 1>, scalar_prefetch = 0 : i64, scratch_operands = 0 : i64, tpu.core_type = #tpu.core_type<tc>, window_params = [{transform_indices = @transform_0, window_bounds = array<i64: 1, 2, 2, 1, 16, 16>}, {transform_indices = @transform_1, window_bounds = array<i64: 1, 16, 64>}]} {
    %c0 = arith.constant 0 : index
    %c0_0 = arith.constant 0 : index
    %c0_1 = arith.constant 0 : index
    %c0_2 = arith.constant 0 : index
    %c0_3 = arith.constant 0 : index
    %c0_4 = arith.constant 0 : index
    %0 = vector.load %arg2[%c0, %c0_0, %c0_1, %c0_2, %c0_3, %c0_4] : memref<1x2x2x1x16x16xf32, #tpu.memory_space<vmem>>, vector<1x1x2x1x16x16xf32>
    %1 = vector.shape_cast %0 : vector<1x1x2x1x16x16xf32> to vector<2x1x16x16xf32>
    %2 = tpu.transpose %1, [1, 2, 3, 0] : vector<2x1x16x16xf32> -> vector<1x16x16x2xf32>
    %3 = vector.shape_cast %2 : vector<1x16x16x2xf32> to vector<16x32xf32>
    %c0_5 = arith.constant 0 : index
    %c0_6 = arith.constant 0 : index
    %c0_7 = arith.constant 0 : index
    %4 = vector.load %arg3[%c0_5, %c0_6, %c0_7] : memref<1x16x64xf32, #tpu.memory_space<vmem>>, vector<1x16x32xf32>
    %5 = vector.shape_cast %4 : vector<1x16x32xf32> to vector<16x32xf32>
    %6 = vector.shape_cast %3 : vector<16x32xf32> to vector<1x16x32xf32>
    tpu.vector_store %arg3[%c0_5, %c0_6, %c0_7], %6 {strides = array<i32>} : memref<1x16x64xf32, #tpu.memory_space<vmem>>, vector<1x16x32xf32>,
    %c0_8 = arith.constant 0 : index
    %c1 = arith.constant 1 : index
    %c0_9 = arith.constant 0 : index
    %c0_10 = arith.constant 0 : index
    %c0_11 = arith.constant 0 : index
    %c0_12 = arith.constant 0 : index
    %7 = vector.load %arg2[%c0_8, %c1, %c0_9, %c0_10, %c0_11, %c0_12] : memref<1x2x2x1x16x16xf32, #tpu.memory_space<vmem>>, vector<1x1x2x1x16x16xf32>
    %8 = vector.shape_cast %7 : vector<1x1x2x1x16x16xf32> to vector<2x1x16x16xf32>
    %9 = tpu.transpose %8, [1, 2, 3, 0] : vector<2x1x16x16xf32> -> vector<1x16x16x2xf32>
    %10 = vector.shape_cast %9 : vector<1x16x16x2xf32> to vector<16x32xf32>
    %c0_13 = arith.constant 0 : index
    %c0_14 = arith.constant 0 : index
    %c32 = arith.constant 32 : index
    %11 = vector.load %arg3[%c0_13, %c0_14, %c32] : memref<1x16x64xf32, #tpu.memory_space<vmem>>, vector<1x16x32xf32>
    %12 = vector.shape_cast %11 : vector<1x16x32xf32> to vector<16x32xf32>
    %13 = vector.shape_cast %10 : vector<16x32xf32> to vector<1x16x32xf32>
    tpu.vector_store %arg3[%c0_13, %c0_14, %c32], %13 {strides = array<i32>} : memref<1x16x64xf32, #tpu.memory_space<vmem>>, vector<1x16x32xf32>,
    return
  }
  func.func @transform_0(%arg0: i32, %arg1: i32) -> (i32, i32, i32, i32, i32, i32) {
    %c0_i32 = arith.constant 0 : i32
    %c0_i32_0 = arith.constant 0 : i32
    %c0_i32_1 = arith.constant 0 : i32
    %c0_i32_2 = arith.constant 0 : i32
    %c0_i32_3 = arith.constant 0 : i32
    return %arg0, %c0_i32, %c0_i32_0, %arg1, %c0_i32_1, %c0_i32_2 : i32, i32, i32, i32, i32, i32
  }
  func.func @transform_1(%arg0: i32, %arg1: i32) -> (i32, i32, i32) {
    %c0_i32 = arith.constant 0 : i32
    %c0_i32_0 = arith.constant 0 : i32
    return %arg0, %arg1, %c0_i32 : i32, i32, i32
  }
}

</mosaic_0001>

<bundles_post_ra>
// kernel: tpu_custom_call.1
= control target key start
LH: loop header
LB: loop body
LE: loop exit
PB: predicated region body
PF: predicated region fallthrough
CT: control target
= control target key end

     0   :  { %6 = vsyncpa [#allocation3], 0  ;;  %s5573_s0 = inlined_call_operand.hbm [shape: f32[2,2,2,1,16,16], index: 0, kind: input, shape index: {}]   ;;  %s5574_s1 = inlined_call_operand.hbm [shape: f32[2,16,64], index: 1, kind: output, shape index: {}]  }
   0x1   :  { %8 = vsyncpa [#allocation3 + $0x1], 0 }
   0x2   :  { %9 = vsyncpa [#allocation4], 0 }
   0x3   :  { %11 = vsyncpa [#allocation4 + $0x1], 0  ;;  %s4504_s6 = smov 0   ;;  %s4506_s7 = smov 0  }
   0x4   :  { %s4508_s8 = smov 0   ;;  %s4510_s9 = smov 0  }
   0x5   :  { %s4512_s10 = smov 0   ;;  %s4514_s11 = smov 0  }
   0x6 LB: > { %s4187_s12 = sadd.s32 4294967295, %s4468_s11   ;;  %s4188_s13 = sadd.s32 4294967294, %s4468_s11   ;;  %s4468_s11 = sphi %s4514_s11, %s17_s11   ;;  %s4464_s10 = sphi %s4512_s10, %s5643_s10   ;;  %s4460_s9 = sphi %s4510_s9, %s5642_s9   ;;  %s4456_s8 = sphi %s4508_s8, %s5641_s8   ;;  %s4452_s7 = sphi %s4506_s7, %s5640_s7   ;;  %s4448_s6 = sphi %s4504_s6, %s5639_s6  }
   0x7   : > { %s29_s14 = sadd.s32 1, %s4464_s10  ;;  %s38_s15 = sadd.s32 1, %s4456_s8 }
   0x8   : > { %p31_p0 = scmp.ge.s32.totalorder %s29_s14, 2  ;;  %p45_p1 = scmp.ne.s32.totalorder %s4456_s8, %s4452_s7 }
   0x9   : > { %p46_p2 = scmp.eq.s32.totalorder %s4468_s11, 0  ;;  %p51_p3 = scmp.ne.s32.totalorder %s4452_s7, %s4448_s6 }
   0xa   : > { %s5645_s14 = smov (%p31_p0, %s29_s14), 0  ;;  %p52_p5 = scmp.eq.s32.totalorder %s4187_s12, 0 }
   0xb   : > { %p4545_p4 = por %p46_p2, %p45_p1  ;;  %s33_s17 = ssub.s32 %s4464_s10, %s5645_s14 }
   0xc   : > { %p77_p6 = scmp.eq.s32.totalorder %s4187_s12, 1  ;;  %p36_p7 = scmp.eq.s32.totalorder %s33_s17, 0 }
   0xd   : > { %p4551_p8 = por %p52_p5, %p51_p3  ;;  %p83_p10 = scmp.eq.s32.totalorder %s4188_s13, 1 }
   0xe   : > { %p4555_p9 = por %p77_p6, %p45_p1  ;;  %p4284_p13 = scmp.lt.s32.totalorder %s4468_s11, 2 }
   0xf   : > { %s4560_s20 = scalar_select %p36_p7, %s4456_s8, %s38_s15  }
  0x10   : > { %s5592_s19 = scalar_select %p4555_p9, 1, 0 }
  0x11   : > { %p4562_p11 = por %p83_p10, %p51_p3  ;;  %s103_s22 = sand.u32 1, %s4456_s8  }
  0x12   : > { %s4191_s23 = sshll.u32 %s103_s22, 6  ;;  %s4270_s24 = sshll.u32 %s4464_s10, 10 }
  0x13   : > { %s5593_s21 = scalar_select %p4562_p11, 1, 0 }
  0x14   : > { %s4573_s27 = scalar_lea.hbm %s5573_s0, %s4270_s24  ;;  %s107_s28 = scalar_lea.vmem [#allocation2], %s4191_s23 }
  0x15   : > { %s116_s29 = sshll.u32 %s107_s28, 4  ;;  %p4579_p0 = pnand %p4284_p13, %p4545_p4  ;;  %s4575_s29 = int_to_ptr.vmem [resolvable:$true] %s116_s29 }
  0x16   : > { %s4584_s2 = scalar_lea.sflag [#allocation3], %s103_s22  ;;  %s4356_s3 = scalar_lea.hbm %s4573_s27, 1024 }
  0x17   : > { %p4357_p2 = scmp.ne.s32.totalorder %s4573_s27, %s4356_s3  ;;  %p4358_p3 = pneg %p4579_p0 }
  0x18   : > { %s4361_s12 = scalar_lea.hbm %s5573_s0, 2048  ;;  %p4362_p4 = scmp.lt.u32.totalorder %s4573_s27, %s5573_s0 }
  0x19   : > { %p4359_p5 = pnand %p4358_p3, %p4357_p2  ;;  %p4363_p7 = scmp.lt.u32.totalorder %s4361_s12, %s4356_s3 }
  0x1a   : > { %p4365_p13 = scmp.lt.u32.totalorder %s4356_s3, %s4573_s27 }
  0x1b   : > { %p4360_p6 = pneg %p4359_p5  ;;  %p4364_p10 = por %p4363_p7, %p4362_p4 }
  0x1d   : > { %p4366_p12 = por %p4365_p13, %p4364_p10 }
  0x1f   : > { %p4367_p1 = pnand %p4366_p12, %p4360_p6 }
  0x21   : > { %4370 = shalt.err (!%p4367_p1)
}
  0x22   : > { %s4371_s16 = scalar_lea.vmem %s4575_s29, 1024  ;;  %s4470_s17 = smov [#allocation2]  }
  0x23   : > { %p4372_p2 = scmp.ne.s32.totalorder %s4575_s29, %s4371_s16  ;;  %s4376_s22 = sshll.u32 %s4470_s17, 4  ;;  %s4377_s22 = int_to_ptr.vmem [resolvable:$false] %s4376_s22 }
  0x24   : > { %s4378_s23 = scalar_lea.vmem %s4377_s22, 2048  ;;  %p4379_p9 = scmp.lt.s32.totalorder %s4575_s29, %s4377_s22 }
  0x25   : > { %p4374_p5 = pnand %p4372_p2, %p4358_p3  ;;  %p4380_p4 = scmp.lt.s32.totalorder %s4378_s23, %s4371_s16 }
  0x27   : > { %p4375_p11 = pneg %p4374_p5  ;;  %p4381_p7 = por %p4380_p4, %p4379_p9 }
  0x29   : > { %p4382_p10 = pnand %p4381_p7, %p4375_p11 }
  0x2b   : > { %4385 = shalt.err (!%p4382_p10)
}
  0x2c   : > { %s4471_s24 = smov 128   ;;  %s4472_s25 = smov 8  }
  0x2d   : > { %4279 = dma.hbm_to_vmem [thread:$0]  (!%p4579_p0), %s4573_s27, 1024, %s4575_s29, %s4584_s2, %s4471_s24, %s4471_s24, %s4472_s25  }
  0x2e   : > { %p124_p12 = scmp.lt.s32.totalorder %s4468_s11, 3  ;;  %p5595_p1 = scmp.ge.s32.totalorder %s4468_s11, 1 }
  0x30   : > { %p125_p3 = pnand %p5595_p1, %p124_p12 }
  0x32   : > { %128 = sbr.rel (%p125_p3) target bundleno = 746 (0x2ea), region = 24 }
  0x39   : > { %s4616_s26 = sand.u32 1, %s4452_s7  }
  0x3a   : > { %s4195_s28 = sshll.u32 %s4616_s26, 6  ;;  %s131_s3 = scalar_lea.sflag [#allocation3], %s4616_s26 }
  0x3b   : > { %s134_s4 = scalar_lea.vmem [#allocation2], %s4195_s28 }
  0x3c   : > { %4439 = dma.done.wait (%p4551_p8), %s131_s3, 1024  }
  0x3d   : > { %4441 = vsyncadd (%p4551_p8), %s131_s3, 4294966272  ;;  %v156_v0 = vld [vmem:[%s134_s4 + $0x10] sm:$0xff]  ;;  %v154_v1 = vld [vmem:[%s134_s4] sm:$0xff]  ;;  %v4473_v8 = vmov 1983009808   ;;  %v226_v10 = vlaneseq  ;;  %v4475_v21 = vmov 0.0  }
  0x3e   : > { %190 = vxpose.xlu1.b32.start [1/2] (short) (narrow) %v156_v0, 16  ;;  %158 = vxpose.xlu0.b32.start [1/2] (short) (narrow) %v154_v1, 16  ;;  %v157_v2 = vld [vmem:[%s134_s4 + $0x18] sm:$0xff]  ;;  %v155_v3 = vld [vmem:[%s134_s4 + $0x8] sm:$0xff]  ;;  %v4229_v4 = vld [vmem:[%s134_s4 + $0x20] sm:$0xff]  ;;  %v224_v9 = vunpack.c.l.s4 %v4473_v8  ;;  %s4476_s18 = smov 2  }
  0x3f   : > { %v4230_v5 = vld [vmem:[%s134_s4 + $0x28] sm:$0xff]  ;;  %v4231_v6 = vld [vmem:[%s134_s4 + $0x30] sm:$0xff]  ;;  %v4232_v7 = vld [vmem:[%s134_s4 + $0x38] sm:$0xff]  ;;  %v227_v12 = vshrl.u32 %v226_v10, 7  ;;  %v4474_v13 = vmov 1934713408  }
  0x40   : > { %v225_v11 = vunpack.c.0.s8 %v224_v9  ;;  %v255_v14 = vunpack.c.l.s4 %v4474_v13  ;;  %s4477_s27 = smov 6   ;;  %s4478_s29 = smov 4   ;;  %vm2077_vm0 = vcmask 31744   ;;  %vm2074_vm1 = vcmask 15360  }
  0x41   : > { %s4479_s30 = smov 8   ;;  %s4480_s2 = smov 10   ;;  %vm2080_vm2 = vcmask 48128   ;;  %vm2083_vm3 = vcmask 64512   ;;  %vm2086_vm4 = vcmask 80896   ;;  %vm2089_vm5 = vcmask 97280  }
  0x42   : > { %191 = vxpose.xlu1.b32.end [2/2] (short) (narrow) %v157_v2, 16  ;;  %159 = vxpose.xlu0.b32.end [2/2] (short) (narrow) %v155_v3, 16  ;;  %v4624_v15 = vsub.s32 %v225_v11, %v227_v12  ;;  %v256_v16 = vunpack.c.0.s8 %v255_v14  ;;  %s4481_s5 = smov 12   ;;  %s4482_s12 = smov 14   ;;  %vm2092_vm6 = vcmask 113664   ;;  %vm2095_vm7 = vcmask 130048  }
  0x43   : > { %s4483_s13 = smov 16   ;;  %s4484_s15 = smov 18   ;;  %vm2098_vm8 = vcmask 146432   ;;  %vm2101_vm9 = vcmask 162816   ;;  %vm2104_vm10 = vcmask 179200   ;;  %vm2107_vm11 = vcmask 195584  }
  0x44   : > { %v4630_v24 = vsub.s32 %v256_v16, %v227_v12  ;;  %s4485_s16 = smov 20   ;;  %s4486_s17 = smov 22   ;;  %vm2110_vm12 = vcmask 211968   ;;  %vm2113_vm13 = vcmask 228352   ;;  %vm2116_vm14 = vcmask 244736  }
  0x45   : > { %s4487_s22 = smov 24   ;;  %s4488_s23 = smov 26   ;;  %vm2119_vm15 = vcmask 261120  }
  0x46   : > { %2127 = vxpose.xlu1.b32.start [1/2] (short) (narrow) %v4229_v4, 16  ;;  %s4489_s24 = smov 28   ;;  %s4490_s25 = smov 30  }
  0x47   : > { %s4491_s28 = smov 32   ;;  %s4196_s3 = sshll.u32 %s4616_s26, 4 }
  0x48   : > { %s152_s4 = scalar_lea.vmem [#allocation5], %s4196_s3  ;;  %p5636_p9 = scmp.ne.s32.totalorder %s5592_s19, 0 }
  0x4a   : > { %2128 = vxpose.xlu1.b32.end [2/2] (short) (narrow) %v4230_v5, 16 }
  0x4e   : > { %2159 = vxpose.xlu1.b32.start [1/2] (short) (narrow) %v4231_v6, 16 }
  0x52   : > { %2160 = vxpose.xlu1.b32.end [2/2] (short) (narrow) %v4232_v7, 16 }
  0xbe   : > { %v206_v17 = vpop.trf.xlu1  ;;  %v174_v18 = vpop.trf.xlu0 }
  0xbf   : > { %v244_v19 = vrot.slane %v206_v17, %v4624_v15  ;;  %v229_v20 = vrot.slane %v174_v18, %v4624_v15  ;;  %v237_v22 = vcombine.high %v206_v17, %v4475_v21  ;;  %v222_v23 = vcombine.high %v174_v18, %v4475_v21 }
  0xc1   : > { %v252_v25 = vcombine.low %v229_v20, %v244_v19  ;;  %v253_v27 = vcombine.high %v229_v20, %v244_v19  ;;  %v251_v28 = vrot.slane %v237_v22, %v4624_v15  ;;  %v236_v29 = vrot.slane %v222_v23, %v4624_v15 }
  0xc2   : > { %v207_v26 = vpop.trf.xlu1  ;;  %v175_v36 = vpop.trf.xlu0 }
  0xc3   : > { %v260_v30 = vrot.slane %v252_v25, %v4630_v24  ;;  %v267_v33 = vrot.slane %v253_v27, %v4630_v24  ;;  %v268_v34 = vcombine.low %v236_v29, %v251_v28  ;;  %v269_v39 = vcombine.high %v236_v29, %v251_v28 }
  0xc4   : > { %v310_v40 = vrot.slane %v207_v26, %v4624_v15  ;;  %v295_v41 = vrot.slane %v175_v36, %v4624_v15  ;;  %v303_v50 = vcombine.high %v207_v26, %v4475_v21  ;;  %v288_v51 = vcombine.high %v175_v36, %v4475_v21 }
  0xc5   : > { %354 = vxpose.xlu0.b32.start.end [1/1] (short) (narrow) %v260_v30, 16  ;;  %v284_v32 = vcombine.high %v260_v30, %v4475_v21  ;;  %v285_v37 = vcombine.high %v267_v33, %v4475_v21  ;;  %v276_v38 = vrot.slane %v268_v34, %v4630_v24  ;;  %v283_v47 = vrot.slane %v269_v39, %v4630_v24 }
  0xc6   : > { %v2143_v31 = vpop.trf.xlu1  ;;  %v318_v48 = vcombine.low %v295_v41, %v310_v40  ;;  %v319_v54 = vcombine.high %v295_v41, %v310_v40  ;;  %v317_v55 = vrot.slane %v303_v50, %v4624_v15  ;;  %v302_v56 = vrot.slane %v288_v51, %v4624_v15 }
  0xc7   : > { %386 = vxpose.xlu1.b32.start.end [1/1] (short) (narrow) %v284_v32, 16  ;;  %v2198_v43 = vrot.slane %v2143_v31, %v4624_v15  ;;  %v286_v45 = vcombine.high %v276_v38, %v4475_v21  ;;  %v287_v52 = vcombine.high %v283_v47, %v4475_v21  ;;  %v2191_v1 = vcombine.high %v2143_v31, %v4475_v21 }
  0xc8   : > { %v326_v53 = vrot.slane %v318_v48, %v4630_v24  ;;  %v333_v58 = vrot.slane %v319_v54, %v4630_v24  ;;  %v334_v59 = vcombine.low %v302_v56, %v317_v55  ;;  %v335_v62 = vcombine.high %v302_v56, %v317_v55 }
  0xc9   : > { %v2205_v4 = vrot.slane %v2191_v1, %v4624_v15 }
  0xca   : > { %v4637_v35 = vpop.trf.xlu1  ;;  %418 = vxpose.xlu0.b32.start.end [1/1] (short) (narrow) %v267_v33, 16  ;;  %v350_v57 = vcombine.high %v326_v53, %v4475_v21  ;;  %v351_v60 = vcombine.high %v333_v58, %v4475_v21  ;;  %v342_v61 = vrot.slane %v334_v59, %v4630_v24  ;;  %v349_v2 = vrot.slane %v335_v62, %v4630_v24 }
  0xcb   : > { %v2264_v13 = vrot.slane %v4637_v35, %v4624_v15  ;;  %v2257_v22 = vcombine.high %v4637_v35, %v4475_v21 }
  0xcc   : > { %450 = vxpose.xlu1.b32.start.end [1/1] (short) (narrow) %v285_v37, 16  ;;  %v352_v0 = vcombine.high %v342_v61, %v4475_v21  ;;  %v353_v5 = vcombine.high %v349_v2, %v4475_v21 }
  0xcd   : > { %v2271_v28 = vrot.slane %v2257_v22, %v4624_v15 }
  0xce   : > { %v2175_v42 = vpop.trf.xlu1 }
  0xcf   : > { %v2213_v44 = vrot.slane %v2175_v42, %v4624_v15  ;;  %v2206_v63 = vcombine.high %v2175_v42, %v4475_v21 }
  0xd1   : > { %v2221_v46 = vcombine.low %v2198_v43, %v2213_v44  ;;  %514 = vxpose.xlu1.b32.start.end [1/1] (short) (narrow) %v286_v45, 16  ;;  %v2220_v3 = vrot.slane %v2206_v63, %v4624_v15  ;;  %v2222_v12 = vcombine.high %v2198_v43, %v2213_v44 }
  0xd2   : > { %v2176_v7 = vpop.trf.xlu1 }
  0xd3   : > { %v2229_v49 = vrot.slane %v2221_v46, %v4630_v24  ;;  %v2237_v6 = vcombine.low %v2205_v4, %v2220_v3  ;;  %v2238_v10 = vcombine.high %v2205_v4, %v2220_v3  ;;  %v2279_v11 = vrot.slane %v2176_v7, %v4624_v15 }
  0xd4   : > { %v2236_v18 = vrot.slane %v2222_v12, %v4630_v24  ;;  %v2272_v19 = vcombine.high %v2176_v7, %v4475_v21 }
  0xd5   : > { %2323 = vxpose.xlu0.b32.start.end [1/1] (short) (narrow) %v2229_v49, 16  ;;  %v2253_v8 = vcombine.high %v2229_v49, %v4475_v21  ;;  %v2245_v9 = vrot.slane %v2237_v6, %v4630_v24  ;;  %v2252_v16 = vrot.slane %v2238_v10, %v4630_v24  ;;  %v2287_v17 = vcombine.low %v2264_v13, %v2279_v11 }
  0xd6   : > { %578 = vxpose.xlu1.b32.start.end [1/1] (short) (narrow) %v287_v52, 16  ;;  %v2288_v25 = vcombine.high %v2264_v13, %v2279_v11  ;;  %v2286_v26 = vrot.slane %v2272_v19, %v4624_v15  ;;  %v2254_v27 = vcombine.high %v2236_v18, %v4475_v21 }
  0xd7   : > { %v2255_v14 = vcombine.high %v2245_v9, %v4475_v21  ;;  %v2256_v20 = vcombine.high %v2252_v16, %v4475_v21  ;;  %v2295_v23 = vrot.slane %v2287_v17, %v4630_v24 }
  0xd8   : > { %v2302_v30 = vrot.slane %v2288_v25, %v4630_v24  ;;  %v2303_v31 = vcombine.low %v2271_v28, %v2286_v26  ;;  %v2304_v34 = vcombine.high %v2271_v28, %v2286_v26 }
  0xd9   : > { %v2319_v29 = vcombine.high %v2295_v23, %v4475_v21 }
  0xda   : > { %482 = vxpose.xlu0.b32.start.end [1/1] (short) (narrow) %v276_v38, 16  ;;  %v2320_v32 = vcombine.high %v2302_v30, %v4475_v21  ;;  %v2311_v33 = vrot.slane %v2303_v31, %v4630_v24  ;;  %v2318_v36 = vrot.slane %v2304_v34, %v4630_v24 }
  0xdb   : > { %642 = vxpose.xlu1.b32.start.end [1/1] (short) (narrow) %v350_v57, 16 }
  0xdc   : > { %v2321_v35 = vcombine.high %v2311_v33, %v4475_v21  ;;  %v2322_v37 = vcombine.high %v2318_v36, %v4475_v21 }
  0xdf   : > { %546 = vxpose.xlu0.b32.start.end [1/1] (short) (narrow) %v283_v47, 16 }
  0xe0   : > { %706 = vxpose.xlu1.b32.start.end [1/1] (short) (narrow) %v351_v60, 16 }
  0xe4   : > { %610 = vxpose.xlu0.b32.start.end [1/1] (short) (narrow) %v326_v53, 16 }
  0xe5   : > { %770 = vxpose.xlu1.b32.start.end [1/1] (short) (narrow) %v352_v0, 16 }
  0xe9   : > { %674 = vxpose.xlu0.b32.start.end [1/1] (short) (narrow) %v333_v58, 16 }
  0xea   : > { %834 = vxpose.xlu1.b32.start.end [1/1] (short) (narrow) %v353_v5, 16 }
  0xee   : > { %738 = vxpose.xlu0.b32.start.end [1/1] (short) (narrow) %v342_v61, 16 }
  0xef   : > { %2355 = vxpose.xlu1.b32.start.end [1/1] (short) (narrow) %v2253_v8, 16 }
  0xf3   : > { %802 = vxpose.xlu0.b32.start.end [1/1] (short) (narrow) %v349_v2, 16 }
  0xf4   : > { %2483 = vxpose.xlu1.b32.start.end [1/1] (short) (narrow) %v2255_v14, 16 }
  0xf8   : > { %2387 = vxpose.xlu0.b32.start.end [1/1] (short) (narrow) %v2236_v18, 16 }
  0xf9   : > { %2547 = vxpose.xlu1.b32.start.end [1/1] (short) (narrow) %v2256_v20, 16 }
  0xfd   : > { %2419 = vxpose.xlu0.b32.start.end [1/1] (short) (narrow) %v2254_v27, 16 }
  0xfe   : > { %2611 = vxpose.xlu1.b32.start.end [1/1] (short) (narrow) %v2319_v29, 16 }
 0x102   : > { %2451 = vxpose.xlu0.b32.start.end [1/1] (short) (narrow) %v2245_v9, 16 }
 0x103   : > { %2675 = vxpose.xlu1.b32.start.end [1/1] (short) (narrow) %v2320_v32, 16 }
 0x107   : > { %2515 = vxpose.xlu0.b32.start.end [1/1] (short) (narrow) %v2252_v16, 16 }
 0x108   : > { %2739 = vxpose.xlu1.b32.start.end [1/1] (short) (narrow) %v2321_v35, 16 }
 0x10c   : > { %2579 = vxpose.xlu0.b32.start.end [1/1] (short) (narrow) %v2295_v23, 16 }
 0x10d   : > { %2803 = vxpose.xlu1.b32.start.end [1/1] (short) (narrow) %v2322_v37, 16 }
 0x111   : > { %2643 = vxpose.xlu0.b32.start.end [1/1] (short) (narrow) %v2302_v30, 16 }
 0x116   : > { %2707 = vxpose.xlu0.b32.start.end [1/1] (short) (narrow) %v2311_v33, 16 }
 0x11b   : > { %2771 = vxpose.xlu0.b32.start.end [1/1] (short) (narrow) %v2318_v36, 16 }
 0x145   : > { %v370_v38 = vpop.trf.xlu0 }
 0x147   : > { %v402_v39 = vpop.trf.xlu1 }
 0x149   : > { %v371_v40 = vpop.trf.xlu0 }
 0x14b   : > { %v403_v41 = vpop.trf.xlu1 }
 0x14d   : > { %v434_v42 = vpop.trf.xlu0 }
 0x14e   : > { %v866_v43 = vcombine.low %v370_v38, %v434_v42  ;;  %v867_v44 = vcombine.high %v370_v38, %v434_v42 }
 0x14f   : > { %v466_v45 = vpop.trf.xlu1 }
 0x150   : > { %v882_v46 = vcombine.low %v402_v39, %v466_v45  ;;  %v883_v47 = vcombine.high %v402_v39, %v466_v45  ;;  %v874_v49 = vrot.slane %v866_v43, %v4624_v15  ;;  %v881_v50 = vrot.slane %v867_v44, %v4624_v15 }
 0x151   : > { %v435_v48 = vpop.trf.xlu0 }
 0x152   : > { %v890_v21 = vrot.slane %v882_v46, %v4624_v15  ;;  %v897_v51 = vrot.slane %v883_v47, %v4624_v15  ;;  %v1138_v52 = vcombine.low %v371_v40, %v435_v48  ;;  %v1139_v53 = vcombine.high %v371_v40, %v435_v48 }
 0x153   : > { %v467_v54 = vpop.trf.xlu1 }
 0x154   : > { %v930_v55 = vcombine.low %v874_v49, %v890_v21  ;;  %v931_v56 = vcombine.high %v874_v49, %v890_v21  ;;  %v946_v57 = vcombine.low %v881_v50, %v897_v51  ;;  %v947_v58 = vcombine.high %v881_v50, %v897_v51 }
 0x155   : > { %v1154_v59 = vcombine.low %v403_v41, %v467_v54  ;;  %v1155_v60 = vcombine.high %v403_v41, %v467_v54  ;;  %v4692_v61 = vpop.trf.xlu0  ;;  %v1146_v2 = vrot.slane %v1138_v52, %v4624_v15  ;;  %v1153_v3 = vrot.slane %v1139_v53, %v4624_v15 }
 0x156   : > { %v938_v62 = vrot.slane %v930_v55, %v4630_v24  ;;  %v945_v63 = vrot.slane %v931_v56, %v4630_v24  ;;  %v954_v0 = vrot.slane %v946_v57, %v4630_v24  ;;  %v961_v1 = vrot.slane %v947_v58, %v4630_v24 }
 0x157   : > { %v1162_v4 = vrot.slane %v1154_v59, %v4624_v15  ;;  %v1169_v5 = vrot.slane %v1155_v60, %v4624_v15  ;;  %v4702_v6 = vpop.trf.xlu1 }
 0x158   : > { %v4197_v7 = vcombine.low %v938_v62, %v945_v63  ;;  %v4199_v8 = vcombine.high %v938_v62, %v945_v63  ;;  %v4201_v9 = vcombine.low %v954_v0, %v961_v1  ;;  %v4203_v10 = vcombine.high %v954_v0, %v961_v1 }
 0x159   : > { %v1202_v11 = vcombine.low %v1146_v2, %v1162_v4  ;;  %v1203_v12 = vcombine.high %v1146_v2, %v1162_v4  ;;  %v1218_v13 = vcombine.low %v1153_v3, %v1169_v5  ;;  %v1219_v14 = vcombine.high %v1153_v3, %v1169_v5  ;;  %v4704_v16 = vpop.trf.xlu0 }
 0x15a   : > { %v1418_v17 = vrot.slane %v4197_v7, %v4624_v15  ;;  %v1434_v18 = vrot.slane %v4199_v8, %v4624_v15  ;;  %v1450_v19 = vrot.slane %v4201_v9, %v4624_v15  ;;  %v1466_v20 = vrot.slane %v4203_v10, %v4624_v15 }
 0x15b   : > { %v1210_v22 = vrot.slane %v1202_v11, %v4630_v24  ;;  %v1217_v23 = vrot.slane %v1203_v12, %v4630_v24  ;;  %v1226_v25 = vrot.slane %v1218_v13, %v4630_v24  ;;  %v1233_v26 = vrot.slane %v1219_v14, %v4630_v24  ;;  %v4714_v27 = vpop.trf.xlu1 }
 0x15c   : > { %v1474_v28 = vcombine.low %v1418_v17, %v1434_v18  ;;  %v1506_v29 = vcombine.low %v1450_v19, %v1466_v20  ;;  %v1475_v30 = vcombine.high %v1418_v17, %v1434_v18  ;;  %v1507_v39 = vcombine.high %v1450_v19, %v1466_v20 }
 0x15d   : > { %v4205_v31 = vcombine.low %v1210_v22, %v1217_v23  ;;  %v4207_v32 = vcombine.high %v1210_v22, %v1217_v23  ;;  %v4209_v33 = vcombine.low %v1226_v25, %v1233_v26  ;;  %v4211_v34 = vcombine.high %v1226_v25, %v1233_v26  ;;  %v498_v35 = vpop.trf.xlu0 }
 0x15e   : > { %v4717_v36 = vrot.slane %v1474_v28, %v4630_v24  ;;  %v4720_v37 = vrot.slane %v1506_v29, %v4630_v24  ;;  %v4723_v38 = vrot.slane %v1475_v30, %v4630_v24  ;;  %v4736_v50 = vrot.slane %v1507_v39, %v4630_v24 }
 0x15f   : > { %v594_v40 = vpop.trf.xlu1  ;;  %v1554_v41 = vrot.slane %v4205_v31, %v4624_v15  ;;  %v1570_v42 = vrot.slane %v4207_v32, %v4624_v15  ;;  %v1586_v43 = vrot.slane %v4209_v33, %v4624_v15  ;;  %v1602_v44 = vrot.slane %v4211_v34, %v4624_v15 }
 0x160   : > { %5596 = vst [vmem:[#allocation8_spill] sm:$0xff] %v4717_v36  ;;  %5597 = vst [vmem:[#allocation9_spill] sm:$0xff] %v4720_v37  ;;  %v1539_v45 = vcombine.high %v4717_v36, %v4720_v37  ;;  %v914_v17 = vcombine.low %v4702_v6, %v594_v40  ;;  %v915_v19 = vcombine.high %v4702_v6, %v594_v40 }
 0x161   : > { %5598 = vst [vmem:[#allocation10_spill] sm:$0xff] %v4723_v38  ;;  %v4733_v47 = vpop.trf.xlu0  ;;  %v1610_v48 = vcombine.low %v1554_v41, %v1570_v42  ;;  %v1642_v49 = vcombine.low %v1586_v43, %v1602_v44  ;;  %5599 = vst [vmem:[#allocation11_spill] sm:$0xff] %v4736_v50  ;;  %v1611_v21 = vcombine.high %v1554_v41, %v1570_v42 }
 0x162   : > { %1956 = vrot.lane.b32.xlu0 %v1539_v45, %s4476_s18  ;;  %v1643_v51 = vcombine.high %v1586_v43, %v1602_v44  ;;  %v922_v30 = vrot.slane %v914_v17, %v4624_v15  ;;  %v929_v34 = vrot.slane %v915_v19, %v4624_v15 }
 0x163   : > { %v4740_v52 = vrot.slane %v1610_v48, %v4630_v24  ;;  %v4743_v53 = vrot.slane %v1642_v49, %v4630_v24  ;;  %v595_v54 = vpop.trf.xlu1  ;;  %v4750_v57 = vrot.slane %v1611_v21, %v4630_v24 }
 0x164   : > { %v4753_v58 = vrot.slane %v1643_v51, %v4630_v24  ;;  %v1186_v26 = vcombine.low %v4714_v27, %v595_v54  ;;  %v1187_v28 = vcombine.high %v4714_v27, %v595_v54 }
 0x165   : > { %5600 = vst [vmem:[#allocation12_spill] sm:$0xff] %v4740_v52  ;;  %5601 = vst [vmem:[#allocation13_spill] sm:$0xff] %v4743_v53  ;;  %v562_v59 = vpop.trf.xlu0  ;;  %v1675_v60 = vcombine.high %v4740_v52, %v4743_v53 }
 0x166   : > { %5602 = vst [vmem:[#allocation14_spill] sm:$0xff] %v4750_v57  ;;  %5603 = vst [vmem:[#allocation15_spill] sm:$0xff] %v4753_v58  ;;  %v898_v18 = vcombine.low %v498_v35, %v562_v59  ;;  %v899_v20 = vcombine.high %v498_v35, %v562_v59  ;;  %v4793_v27 = vrot.slane %v1186_v26, %v4624_v15 }
 0x167   : > { %1958 = vrot.lane.b32.xlu1 %v1675_v60, %s4476_s18  ;;  %v4760_v63 = vpop.trf.xlu1  ;;  %v4796_v43 = vrot.slane %v1187_v28, %v4624_v15 }
 0x168   : > { %v906_v31 = vrot.slane %v898_v18, %v4624_v15  ;;  %v913_v39 = vrot.slane %v899_v20, %v4624_v15 }
 0x169   : > { %v4766_v2 = vpop.trf.xlu0 }
 0x16a   : > { %v962_v45 = vcombine.low %v906_v31, %v922_v30  ;;  %v963_v48 = vcombine.high %v906_v31, %v922_v30  ;;  %v978_v51 = vcombine.low %v913_v39, %v929_v34  ;;  %v979_v54 = vcombine.high %v913_v39, %v929_v34 }
 0x16b   : > { %v4768_v3 = vpop.trf.xlu1  ;;  %v1170_v59 = vcombine.low %v4733_v47, %v4766_v2  ;;  %v1171_v60 = vcombine.high %v4733_v47, %v4766_v2 }
 0x16c   : > { %v977_v30 = vrot.slane %v963_v48, %v4630_v24  ;;  %v4835_v48 = vrot.slane %v978_v51, %v4630_v24 }
 0x16d   : > { %v4770_v4 = vpop.trf.xlu0 }
 0x16f   : > { %v4772_v5 = vpop.trf.xlu1 }
 0x171   : > { %v4774_v7 = vpop.trf.xlu0 }
 0x173   : > { %v4776_v8 = vpop.trf.xlu1 }
 0x175   : > { %v4778_v9 = vpop.trf.xlu0 }
 0x177   : > { %v786_v10 = vpop.trf.xlu1 }
 0x179   : > { %v4780_v11 = vpop.trf.xlu0 }
 0x17b   : > { %v787_v12 = vpop.trf.xlu1 }
 0x17d   : > { %v754_v13 = vpop.trf.xlu0 }
 0x17f   : > { %v850_v14 = vpop.trf.xlu1 }
 0x180   : > { %v1050_v23 = vcombine.low %v786_v10, %v850_v14  ;;  %v1051_v25 = vcombine.high %v786_v10, %v850_v14 }
 0x181   : > { %v755_v22 = vpop.trf.xlu0 }
 0x182   : > { %v1058_v35 = vrot.slane %v1050_v23, %v4624_v15  ;;  %v1065_v40 = vrot.slane %v1051_v25, %v4624_v15 }
 0x183   : > { %v851_v29 = vpop.trf.xlu1 }
 0x184   : > { %v1322_v32 = vcombine.low %v787_v12, %v851_v29  ;;  %v1323_v33 = vcombine.high %v787_v12, %v851_v29  ;;  %v970_v29 = vrot.slane %v962_v45, %v4630_v24 }
 0x185   : > { %v818_v6 = vpop.trf.xlu0 }
 0x186   : > { %v1034_v41 = vcombine.low %v754_v13, %v818_v6  ;;  %v1035_v42 = vcombine.high %v754_v13, %v818_v6  ;;  %v1330_v18 = vrot.slane %v1322_v32, %v4624_v15  ;;  %v1337_v19 = vrot.slane %v1323_v33, %v4624_v15 }
 0x187   : > { %v4798_v44 = vpop.trf.xlu1 }
 0x188   : > { %v1042_v49 = vrot.slane %v1034_v41, %v4624_v15  ;;  %v1049_v21 = vrot.slane %v1035_v42, %v4624_v15 }
 0x189   : > { %v819_v10 = vpop.trf.xlu0 }
 0x18a   : > { %v1098_v12 = vcombine.low %v1042_v49, %v1058_v35  ;;  %v1099_v13 = vcombine.high %v1042_v49, %v1058_v35  ;;  %v1114_v14 = vcombine.low %v1049_v21, %v1065_v40  ;;  %v1115_v17 = vcombine.high %v1049_v21, %v1065_v40 }
 0x18b   : > { %v1306_v20 = vcombine.low %v755_v22, %v819_v10  ;;  %v1307_v23 = vcombine.high %v755_v22, %v819_v10  ;;  %v4808_v25 = vpop.trf.xlu1  ;;  %v4838_v49 = vrot.slane %v979_v54, %v4630_v24  ;;  %v1178_v21 = vrot.slane %v1170_v59, %v4624_v15 }
 0x18c   : > { %v4811_v26 = vrot.slane %v1098_v12, %v4630_v24  ;;  %v4814_v28 = vrot.slane %v1099_v13, %v4630_v24  ;;  %v4817_v47 = vrot.slane %v1114_v14, %v4630_v24  ;;  %v4820_v2 = vrot.slane %v1115_v17, %v4630_v24 }
 0x18d   : > { %v1314_v22 = vrot.slane %v1306_v20, %v4624_v15  ;;  %v1321_v31 = vrot.slane %v1307_v23, %v4624_v15  ;;  %v2403_v32 = vpop.trf.xlu0  ;;  %v4842_v10 = vrot.slane %v1171_v60, %v4624_v15  ;;  %v4198_v54 = vcombine.low %v970_v29, %v977_v30 }
 0x18e   : > { %v2835_v59 = vcombine.low %v4692_v61, %v2403_v32 }
 0x18f   : > { %v1370_v35 = vcombine.low %v1314_v22, %v1330_v18  ;;  %v1371_v40 = vcombine.high %v1314_v22, %v1330_v18  ;;  %v1386_v41 = vcombine.low %v1321_v31, %v1337_v19  ;;  %v1387_v42 = vcombine.high %v1321_v31, %v1337_v19  ;;  %v2499_v45 = vpop.trf.xlu1 }
 0x190   : > { %v4200_v18 = vcombine.high %v970_v29, %v977_v30  ;;  %v1234_v30 = vcombine.low %v1178_v21, %v4793_v27  ;;  %v4888_v55 = vrot.slane %v4198_v54, %v4624_v15 }
 0x191   : > { %v4845_v12 = vrot.slane %v1370_v35, %v4630_v24  ;;  %v4848_v13 = vrot.slane %v1371_v40, %v4630_v24  ;;  %v4851_v14 = vrot.slane %v1386_v41, %v4630_v24  ;;  %v4854_v51 = vrot.slane %v1387_v42, %v4630_v24  ;;  %v2404_v17 = vpop.trf.xlu0 }
 0x192   : > { %v2836_v35 = vcombine.high %v4692_v61, %v2403_v32  ;;  %v1235_v40 = vcombine.high %v1178_v21, %v4793_v27  ;;  %v3107_v62 = vcombine.low %v4704_v16, %v2404_v17  ;;  %v2843_v27 = vrot.slane %v2835_v59, %v4624_v15  ;;  %5604 = vst [vmem:[#allocation16_spill] sm:$0xff] %v4888_v55 }
 0x193   : > { %v4865_v22 = vpop.trf.xlu1  ;;  %v3108_v32 = vcombine.high %v4704_v16, %v2404_v17  ;;  %v4891_v29 = vrot.slane %v4200_v18, %v4624_v15 }
 0x194   : > { %v2850_v31 = vrot.slane %v2836_v35, %v4624_v15  ;;  %v3115_v16 = vrot.slane %v3107_v62, %v4624_v15 }
 0x195   : > { %v2435_v46 = vpop.trf.xlu0  ;;  %5605 = vst [vmem:[#allocation17_spill] sm:$0xff] %v4891_v29  ;;  %v3122_v35 = vrot.slane %v3108_v32, %v4624_v15 }
 0x196   : > { %v2851_v56 = vcombine.low %v4798_v44, %v2435_v46  ;;  %v2852_v61 = vcombine.high %v4798_v44, %v2435_v46  ;;  %v4897_v46 = vrot.slane %v1234_v30, %v4630_v24  ;;  %v4900_v44 = vrot.slane %v1235_v40, %v4630_v24 }
 0x197   : > { %v2563_v21 = vpop.trf.xlu1 }
 0x198   : > { %v2859_v1 = vrot.slane %v2851_v56, %v4624_v15  ;;  %v2866_v0 = vrot.slane %v2852_v61, %v4624_v15  ;;  %v2883_v23 = vcombine.low %v2499_v45, %v2563_v21  ;;  %v2884_v54 = vcombine.high %v2499_v45, %v2563_v21 }
 0x199   : > { %v2436_v17 = vpop.trf.xlu0 }
 0x19a   : > { %v2899_v59 = vcombine.low %v2843_v27, %v2859_v1  ;;  %v2900_v18 = vcombine.high %v2843_v27, %v2859_v1  ;;  %v2915_v20 = vcombine.low %v2850_v31, %v2866_v0  ;;  %v2916_v19 = vcombine.high %v2850_v31, %v2866_v0 }
 0x19b   : > { %v3123_v56 = vcombine.low %v4808_v25, %v2436_v17  ;;  %v3124_v61 = vcombine.high %v4808_v25, %v2436_v17  ;;  %v4907_v30 = vrot.slane %v2883_v23, %v4624_v15  ;;  %v2564_v60 = vpop.trf.xlu1  ;;  %v4916_v27 = vrot.slane %v2884_v54, %v4624_v15 }
 0x19c   : > { %v2907_v40 = vrot.slane %v2899_v59, %v4630_v24  ;;  %v2914_v62 = vrot.slane %v2900_v18, %v4630_v24  ;;  %v2923_v45 = vrot.slane %v2915_v20, %v4630_v24  ;;  %v2930_v1 = vrot.slane %v2916_v19, %v4630_v24 }
 0x19d   : > { %v3131_v0 = vrot.slane %v3123_v56, %v4624_v15  ;;  %v3138_v31 = vrot.slane %v3124_v61, %v4624_v15  ;;  %v2467_v25 = vpop.trf.xlu0  ;;  %v3155_v23 = vcombine.low %v4865_v22, %v2564_v60  ;;  %v3156_v19 = vcombine.high %v4865_v22, %v2564_v60 }
 0x19e   : > { %v4233_v32 = vcombine.low %v2907_v40, %v2914_v62  ;;  %v4235_v21 = vcombine.high %v2907_v40, %v2914_v62  ;;  %v4237_v17 = vcombine.low %v2923_v45, %v2930_v1  ;;  %v4239_v59 = vcombine.high %v2923_v45, %v2930_v1 }
 0x19f   : > { %v3171_v6 = vcombine.low %v3115_v16, %v3131_v0  ;;  %v3172_v18 = vcombine.high %v3115_v16, %v3131_v0  ;;  %v3187_v39 = vcombine.low %v3122_v35, %v3138_v31  ;;  %v3188_v20 = vcombine.high %v3122_v35, %v3138_v31  ;;  %v4919_v34 = vpop.trf.xlu1 }
 0x1a0   : > { %v4923_v56 = vrot.slane %v3155_v23, %v4624_v15  ;;  %v3387_v54 = vrot.slane %v4233_v32, %v4624_v15  ;;  %v3403_v61 = vrot.slane %v4235_v21, %v4624_v15  ;;  %v3419_v45 = vrot.slane %v4237_v17, %v4624_v15 }
 0x1a1   : > { %v3179_v33 = vrot.slane %v3171_v6, %v4630_v24  ;;  %v3186_v40 = vrot.slane %v3172_v18, %v4630_v24  ;;  %v3195_v62 = vrot.slane %v3187_v39, %v4630_v24  ;;  %v3202_v16 = vrot.slane %v3188_v20, %v4630_v24  ;;  %v2468_v35 = vpop.trf.xlu0 }
 0x1a2   : > { %v3435_v60 = vrot.slane %v4239_v59, %v4624_v15  ;;  %v3443_v22 = vcombine.low %v3387_v54, %v3403_v61  ;;  %v3444_v1 = vcombine.high %v3387_v54, %v3403_v61 }
 0x1a3   : > { %v4241_v0 = vcombine.low %v3179_v33, %v3186_v40  ;;  %v4243_v31 = vcombine.high %v3179_v33, %v3186_v40  ;;  %v4245_v23 = vcombine.low %v3195_v62, %v3202_v16  ;;  %v4247_v32 = vcombine.high %v3195_v62, %v3202_v16  ;;  %v4933_v21 = vpop.trf.xlu1 }
 0x1a4   : > { %v4936_v6 = vrot.slane %v3443_v22, %v4630_v24  ;;  %v3475_v18 = vcombine.low %v3419_v45, %v3435_v60  ;;  %v4939_v39 = vrot.slane %v3444_v1, %v4630_v24  ;;  %v3476_v20 = vcombine.high %v3419_v45, %v3435_v60 }
 0x1a5   : > { %v2531_v42 = vpop.trf.xlu0  ;;  %v3523_v17 = vrot.slane %v4241_v0, %v4624_v15  ;;  %v3539_v59 = vrot.slane %v4243_v31, %v4624_v15  ;;  %v3555_v54 = vrot.slane %v4245_v23, %v4624_v15  ;;  %v3571_v33 = vrot.slane %v4247_v32, %v4624_v15 }
 0x1a6   : > { %v2867_v61 = vcombine.low %v2467_v25, %v2531_v42  ;;  %v2868_v40 = vcombine.high %v2467_v25, %v2531_v42  ;;  %v4946_v62 = vrot.slane %v3475_v18, %v4630_v24  ;;  %v3490_v16 = vrot.slane %v3476_v20, %v4630_v24 }
 0x1a7   : > { %v3170_v22 = vrot.slane %v3156_v19, %v4624_v15  ;;  %v3579_v1 = vcombine.low %v3523_v17, %v3539_v59  ;;  %v3611_v45 = vcombine.low %v3555_v54, %v3571_v33  ;;  %v2691_v60 = vpop.trf.xlu1  ;;  %v3580_v41 = vcombine.high %v3523_v17, %v3539_v59 }
 0x1a8   : > { %v2875_v0 = vrot.slane %v2867_v61, %v4624_v15  ;;  %v2882_v31 = vrot.slane %v2868_v40, %v4624_v15  ;;  %v3508_v23 = vcombine.high %v4936_v6, %v4946_v62  ;;  %v3612_v32 = vcombine.high %v3555_v54, %v3571_v33 }
 0x1a9   : > { %v2532_v42 = vpop.trf.xlu0  ;;  %v3510_v25 = vcombine.high %v4939_v39, %v3490_v16  ;;  %v4956_v18 = vrot.slane %v3579_v1, %v4630_v24  ;;  %v4959_v19 = vrot.slane %v3611_v45, %v4630_v24  ;;  %v2987_v20 = vcombine.low %v4919_v34, %v2691_v60 }
 0x1aa   : > { %v2931_v17 = vcombine.low %v2875_v0, %v4907_v30  ;;  %v2932_v59 = vcombine.high %v2875_v0, %v4907_v30  ;;  %v2947_v61 = vcombine.low %v2882_v31, %v4916_v27  ;;  %v2948_v40 = vcombine.high %v2882_v31, %v4916_v27  ;;  %3925 = vrot.lane.b32.xlu0 %v3508_v23, %s4476_s18 }
 0x1ab   : > { %v3139_v54 = vcombine.low %v2468_v35, %v2532_v42  ;;  %v3140_v33 = vcombine.high %v2468_v35, %v2532_v42  ;;  %v3644_v1 = vcombine.high %v4956_v18, %v4959_v19  ;;  %v2988_v45 = vcombine.high %v4919_v34, %v2691_v60  ;;  %v2692_v53 = vpop.trf.xlu1 }
 0x1ac   : > { %v2939_v52 = vrot.slane %v2931_v17, %v4630_v24  ;;  %v2946_v37 = vrot.slane %v2932_v59, %v4630_v24  ;;  %v2955_v30 = vrot.slane %v2947_v61, %v4630_v24  ;;  %v2962_v0 = vrot.slane %v2948_v40, %v4630_v24 }
 0x1ad   : > { %v3147_v27 = vrot.slane %v3139_v54, %v4624_v15  ;;  %v3154_v31 = vrot.slane %v3140_v33, %v4624_v15  ;;  %3927 = vrot.lane.b32.xlu1 %v3644_v1, %s4476_s18  ;;  %v4978_v35 = vrot.slane %v2987_v20, %v4624_v15  ;;  %v2595_v23 = vpop.trf.xlu0  ;;  %v3509_v34 = vcombine.low %v4939_v39, %v3490_v16  ;;  %s4271_s18 = sshll.u32 %s4460_s9, 8  ;;  %s4492_s9 = smov [#allocation5]  }
 0x1ae   : > { %v4234_v60 = vcombine.low %v2939_v52, %v2946_v37  ;;  %v4236_v42 = vcombine.high %v2939_v52, %v2946_v37  ;;  %v4238_v17 = vcombine.low %v2955_v30, %v2962_v0  ;;  %v4240_v59 = vcombine.high %v2955_v30, %v2962_v0  ;;  %3941 = vrot.lane.b32.xlu0 %v3510_v25, %s4477_s27 }
 0x1af   : > { %v3203_v61 = vcombine.low %v3147_v27, %v4923_v56  ;;  %v3204_v40 = vcombine.high %v3147_v27, %v4923_v56  ;;  %v3219_v54 = vcombine.low %v3154_v31, %v3170_v22  ;;  %v3220_v33 = vcombine.high %v3154_v31, %v3170_v22  ;;  %v4984_v1 = vpop.trf.xlu1 }
 0x1b0   : > { %v3259_v20 = vcombine.low %v4933_v21, %v2692_v53  ;;  %v3260_v36 = vcombine.high %v4933_v21, %v2692_v53  ;;  %v3594_v39 = vrot.slane %v3580_v41, %v4630_v24  ;;  %v3626_v37 = vrot.slane %v3612_v32, %v4630_v24 }
 0x1b1   : > { %v3211_v52 = vrot.slane %v3203_v61, %v4630_v24  ;;  %v3218_v16 = vrot.slane %v3204_v40, %v4630_v24  ;;  %v3227_v25 = vrot.slane %v3219_v54, %v4630_v24  ;;  %v3234_v56 = vrot.slane %v3220_v33, %v4630_v24  ;;  %3933 = vrot.lane.b32.xlu1 %v3509_v34, %s4478_s29  ;;  %v2596_v22 = vpop.trf.xlu0 }
 0x1b2   : > { %v3002_v30 = vrot.slane %v2988_v45, %v4624_v15  ;;  %v4997_v53 = vrot.slane %v3259_v20, %v4624_v15  ;;  %v5000_v41 = vrot.slane %v3260_v36, %v4624_v15  ;;  %v3645_v21 = vcombine.low %v3594_v39, %v3626_v37 }
 0x1b3   : > { %v4242_v32 = vcombine.low %v3211_v52, %v3218_v16  ;;  %v4244_v0 = vcombine.high %v3211_v52, %v3218_v16  ;;  %v4246_v27 = vcombine.low %v3227_v25, %v3234_v56  ;;  %v4248_v31 = vcombine.high %v3227_v25, %v3234_v56  ;;  %v5002_v61 = vpop.trf.xlu1 }
 0x1b4   : > { %v3394_v40 = vrot.slane %v4234_v60, %v4624_v15  ;;  %v3410_v34 = vrot.slane %v4236_v42, %v4624_v15  ;;  %v3426_v54 = vrot.slane %v4238_v17, %v4624_v15  ;;  %v3442_v45 = vrot.slane %v4240_v59, %v4624_v15 }
 0x1b5   : > { %3935 = vrot.lane.b32.xlu1 %v3645_v21, %s4478_s29  ;;  %v2659_v33 = vpop.trf.xlu0  ;;  %v5010_v36 = vrot.slane %v4242_v32, %v4624_v15  ;;  %v5013_v20 = vrot.slane %v4244_v0, %v4624_v15  ;;  %v5016_v52 = vrot.slane %v4246_v27, %v4624_v15  ;;  %v5019_v60 = vrot.slane %v4248_v31, %v4624_v15 }
 0x1b6   : > { %v2971_v42 = vcombine.low %v2595_v23, %v2659_v33  ;;  %v2972_v16 = vcombine.high %v2595_v23, %v2659_v33  ;;  %v3459_v17 = vcombine.low %v3394_v40, %v3410_v34  ;;  %v3491_v25 = vcombine.low %v3426_v54, %v3442_v45 }
 0x1b7   : > { %v3646_v59 = vcombine.high %v3594_v39, %v3626_v37  ;;  %v3595_v56 = vcombine.low %v5010_v36, %v5013_v20  ;;  %v3627_v21 = vcombine.low %v5016_v52, %v5019_v60  ;;  %v2819_v32 = vpop.trf.xlu1  ;;  %v3460_v0 = vcombine.high %v3394_v40, %v3410_v34 }
 0x1b8   : > { %v2979_v58 = vrot.slane %v2971_v42, %v4624_v15  ;;  %v2986_v27 = vrot.slane %v2972_v16, %v4624_v15  ;;  %v3467_v31 = vrot.slane %v3459_v17, %v4630_v24  ;;  %v3499_v57 = vrot.slane %v3491_v25, %v4630_v24 }
 0x1b9   : > { %3943 = vrot.lane.b32.xlu1 %v3646_v59, %s4477_s27  ;;  %v2660_v23 = vpop.trf.xlu0  ;;  %v3603_v39 = vrot.slane %v3595_v56, %v4630_v24  ;;  %v3635_v37 = vrot.slane %v3627_v21, %v4630_v24  ;;  %v3019_v33 = vcombine.low %v4984_v1, %v2819_v32  ;;  %v3492_v50 = vcombine.high %v3426_v54, %v3442_v45 }
 0x1ba   : > { %v3035_v40 = vcombine.low %v2979_v58, %v4978_v35  ;;  %v3036_v34 = vcombine.high %v2979_v58, %v4978_v35  ;;  %v3051_v42 = vcombine.low %v2986_v27, %v3002_v30  ;;  %v3052_v16 = vcombine.high %v2986_v27, %v3002_v30 }
 0x1bb   : > { %v3511_v38 = vcombine.low %v3467_v31, %v3499_v57  ;;  %v3243_v17 = vcombine.low %v2596_v22, %v2660_v23  ;;  %v3244_v55 = vcombine.high %v2596_v22, %v2660_v23  ;;  %v3020_v25 = vcombine.high %v4984_v1, %v2819_v32 }
 0x1bc   : > { %v3043_v59 = vrot.slane %v3035_v40, %v4630_v24  ;;  %v3050_v56 = vrot.slane %v3036_v34, %v4630_v24  ;;  %v3059_v21 = vrot.slane %v3051_v42, %v4630_v24  ;;  %v3066_v29 = vrot.slane %v3052_v16, %v4630_v24 }
 0x1bd   : > { %3949 = vrot.lane.b32.xlu0 %v3511_v38, %s4479_s30  ;;  %v3251_v58 = vrot.slane %v3243_v17, %v4624_v15  ;;  %v3258_v35 = vrot.slane %v3244_v55, %v4624_v15  ;;  %v3512_v30 = vcombine.high %v3467_v31, %v3499_v57  ;;  %v3647_v54 = vcombine.low %v3603_v39, %v3635_v37  ;;  %v2723_v22 = vpop.trf.xlu0  ;;  %v2820_v55 = vpop.trf.xlu1 }
 0x1be   : > { %v4249_v45 = vcombine.low %v3043_v59, %v3050_v56  ;;  %v4251_v1 = vcombine.high %v3043_v59, %v3050_v56  ;;  %v4253_v32 = vcombine.low %v3059_v21, %v3066_v29  ;;  %v5044_v27 = vrot.slane %v3019_v33, %v4624_v15 }
 0x1bf   : > { %v3307_v23 = vcombine.low %v3251_v58, %v4997_v53  ;;  %v3308_v40 = vcombine.high %v3251_v58, %v4997_v53  ;;  %v3323_v34 = vcombine.low %v3258_v35, %v5000_v41  ;;  %v3324_v38 = vcombine.high %v3258_v35, %v5000_v41  ;;  %3951 = vrot.lane.b32.xlu1 %v3647_v54, %s4479_s30 }
 0x1c0   : > { %v4255_v57 = vcombine.high %v3059_v21, %v3066_v29  ;;  %v3474_v31 = vrot.slane %v3460_v0, %v4630_v24  ;;  %v3506_v42 = vrot.slane %v3492_v50, %v4630_v24  ;;  %v3648_v16 = vcombine.high %v3603_v39, %v3635_v37 }
 0x1c1   : > { %v3315_v33 = vrot.slane %v3307_v23, %v4630_v24  ;;  %v3322_v17 = vrot.slane %v3308_v40, %v4630_v24  ;;  %v3331_v59 = vrot.slane %v3323_v34, %v4630_v24  ;;  %v3338_v53 = vrot.slane %v3324_v38, %v4630_v24  ;;  %3957 = vrot.lane.b32.xlu0 %v3512_v30, %s4480_s2  ;;  %v2724_v41 = vpop.trf.xlu0 }
 0x1c2   : > { %v3034_v56 = vrot.slane %v3020_v25, %v4624_v15  ;;  %v3513_v29 = vcombine.low %v3474_v31, %v3506_v42  ;;  %v3291_v0 = vcombine.low %v5002_v61, %v2820_v55  ;;  %v3292_v50 = vcombine.high %v5002_v61, %v2820_v55 }
 0x1c3   : > { %v4257_v39 = vcombine.low %v3315_v33, %v3322_v17  ;;  %v4259_v37 = vcombine.high %v3315_v33, %v3322_v17  ;;  %v4261_v21 = vcombine.low %v3331_v59, %v3338_v53  ;;  %3959 = vrot.lane.b32.xlu1 %v3648_v16, %s4480_s2  ;;  %v3514_v58 = vcombine.high %v3474_v31, %v3506_v42 }
 0x1c4   : > { %v4263_v35 = vcombine.high %v3331_v59, %v3338_v53  ;;  %v5063_v54 = vrot.slane %v3291_v0, %v4624_v15  ;;  %v3596_v30 = vcombine.high %v5010_v36, %v5013_v20  ;;  %v3628_v25 = vcombine.high %v5016_v52, %v5019_v60 }
 0x1c5   : > { %3965 = vrot.lane.b32.xlu0 %v3513_v29, %s4481_s5  ;;  %v2787_v61 = vpop.trf.xlu0  ;;  %v5071_v23 = vrot.slane %v4249_v45, %v4624_v15  ;;  %v5074_v40 = vrot.slane %v4251_v1, %v4624_v15  ;;  %v5077_v34 = vrot.slane %v4253_v32, %v4624_v15  ;;  %v3707_v38 = vrot.slane %v4255_v57, %v4624_v15 }
 0x1c6   : > { %v3610_v36 = vrot.slane %v3596_v30, %v4630_v24  ;;  %v3642_v20 = vrot.slane %v3628_v25, %v4630_v24  ;;  %v3003_v52 = vcombine.low %v2723_v22, %v2787_v61  ;;  %v3004_v60 = vcombine.high %v2723_v22, %v2787_v61 }
 0x1c7   : > { %v3306_v55 = vrot.slane %v3292_v50, %v4624_v15  ;;  %v3715_v45 = vcombine.low %v5071_v23, %v5074_v40  ;;  %v3747_v31 = vcombine.low %v5077_v34, %v3707_v38  ;;  %v5087_v1 = vrot.slane %v4257_v39, %v4624_v15 }
 0x1c8   : > { %v3649_v32 = vcombine.low %v3610_v36, %v3642_v20  ;;  %v3011_v42 = vrot.slane %v3003_v52, %v4624_v15  ;;  %v3018_v57 = vrot.slane %v3004_v60, %v4624_v15  ;;  %v5092_v16 = vrot.slane %v4259_v37, %v4624_v15 }
 0x1c9   : > { %3973 = vrot.lane.b32.xlu0 %v3514_v58, %s4482_s12  ;;  %v3723_v22 = vrot.slane %v3715_v45, %v4630_v24  ;;  %v3755_v33 = vrot.slane %v3747_v31, %v4630_v24  ;;  %v2788_v17 = vpop.trf.xlu0  ;;  %v3827_v59 = vrot.slane %v4261_v21, %v4624_v15  ;;  %v3843_v53 = vrot.slane %v4263_v35, %v4624_v15 }
 0x1ca   : > { %3967 = vrot.lane.b32.xlu1 %v3649_v32, %s4481_s5  ;;  %v3067_v29 = vcombine.low %v3011_v42, %v5044_v27  ;;  %v3068_v0 = vcombine.high %v3011_v42, %v5044_v27  ;;  %v3083_v50 = vcombine.low %v3018_v57, %v3034_v56  ;;  %v3084_v39 = vcombine.high %v3018_v57, %v3034_v56 }
 0x1cb   : > { %v3650_v37 = vcombine.high %v3610_v36, %v3642_v20  ;;  %v3779_v30 = vcombine.low %v3723_v22, %v3755_v33  ;;  %v3275_v58 = vcombine.low %v2724_v41, %v2788_v17  ;;  %v3276_v25 = vcombine.high %v2724_v41, %v2788_v17 }
 0x1cc   : > { %v3075_v61 = vrot.slane %v3067_v29, %v4630_v24  ;;  %v3082_v52 = vrot.slane %v3068_v0, %v4630_v24  ;;  %v3091_v21 = vrot.slane %v3083_v50, %v4630_v24  ;;  %v3098_v35 = vrot.slane %v3084_v39, %v4630_v24 }
 0x1cd   : > { %3981 = vrot.lane.b32.xlu0 %v3779_v30, %s4483_s13  ;;  %v3283_v60 = vrot.slane %v3275_v58, %v4624_v15  ;;  %v3290_v27 = vrot.slane %v3276_v25, %v4624_v15  ;;  %v3851_v56 = vcombine.low %v5087_v1, %v5092_v16  ;;  %v3883_v36 = vcombine.low %v3827_v59, %v3843_v53 }
 0x1ce   : > { %v4250_v41 = vcombine.low %v3075_v61, %v3082_v52  ;;  %v4252_v20 = vcombine.high %v3075_v61, %v3082_v52  ;;  %v4254_v45 = vcombine.low %v3091_v21, %v3098_v35  ;;  %3975 = vrot.lane.b32.xlu1 %v3650_v37, %s4482_s12  ;;  %v3780_v31 = vcombine.high %v3723_v22, %v3755_v33 }
 0x1cf   : > { %v3339_v32 = vcombine.low %v3283_v60, %v5063_v54  ;;  %v3340_v42 = vcombine.high %v3283_v60, %v5063_v54  ;;  %v3355_v57 = vcombine.low %v3290_v27, %v3306_v55  ;;  %v3356_v17 = vcombine.high %v3290_v27, %v3306_v55 }
 0x1d0   : > { %v3859_v29 = vrot.slane %v3851_v56, %v4630_v24  ;;  %v3891_v0 = vrot.slane %v3883_v36, %v4630_v24  ;;  %v3716_v50 = vcombine.high %v5071_v23, %v5074_v40  ;;  %v3748_v39 = vcombine.high %v5077_v34, %v3707_v38 }
 0x1d1   : > { %v3347_v30 = vrot.slane %v3339_v32, %v4630_v24  ;;  %v3354_v37 = vrot.slane %v3340_v42, %v4630_v24  ;;  %v3363_v22 = vrot.slane %v3355_v57, %v4630_v24  ;;  %v3370_v33 = vrot.slane %v3356_v17, %v4630_v24  ;;  %3989 = vrot.lane.b32.xlu0 %v3780_v31, %s4484_s15 }
 0x1d2   : > { %v4256_v54 = vcombine.high %v3091_v21, %v3098_v35  ;;  %v3915_v55 = vcombine.low %v3859_v29, %v3891_v0  ;;  %v3730_v58 = vrot.slane %v3716_v50, %v4630_v24  ;;  %v3762_v25 = vrot.slane %v3748_v39, %v4630_v24 }
 0x1d3   : > { %v4258_v23 = vcombine.low %v3347_v30, %v3354_v37  ;;  %v4260_v40 = vcombine.high %v3347_v30, %v3354_v37  ;;  %v4262_v34 = vcombine.low %v3363_v22, %v3370_v33  ;;  %v4264_v38 = vcombine.high %v3363_v22, %v3370_v33 }
 0x1d4   : > { %v5606_v61 = vcombine.low %v4842_v10, %v4796_v43  ;;  %3983 = vrot.lane.b32.xlu1 %v3915_v55, %s4483_s13  ;;  %v3781_v60 = vcombine.low %v3730_v58, %v3762_v25  ;;  %v3852_v21 = vcombine.high %v5087_v1, %v5092_v16  ;;  %v3884_v35 = vcombine.high %v3827_v59, %v3843_v53 }
 0x1d5   : > { %v5136_v27 = vrot.slane %v4258_v23, %v4624_v15  ;;  %v5139_v56 = vrot.slane %v4260_v40, %v4624_v15  ;;  %v5142_v36 = vrot.slane %v4262_v34, %v4624_v15  ;;  %v5145_v31 = vrot.slane %v4264_v38, %v4624_v15 }
 0x1d6   : > { %v5130_v52 = vrot.slane %v5606_v61, %v4630_v24  ;;  %3997 = vrot.lane.b32.xlu0 %v3781_v60, %s4485_s16  ;;  %v3916_v32 = vcombine.high %v3859_v29, %v3891_v0  ;;  %v3866_v42 = vrot.slane %v3852_v21, %v4630_v24  ;;  %v3898_v1 = vrot.slane %v3884_v35, %v4630_v24 }
 0x1d7   : > { %v3666_v16 = vrot.slane %v4250_v41, %v4624_v15  ;;  %v3682_v59 = vrot.slane %v4252_v20, %v4624_v15  ;;  %v3698_v53 = vrot.slane %v4254_v45, %v4624_v15  ;;  %v3714_v57 = vrot.slane %v4256_v54, %v4624_v15 }
 0x1d8   : > { %v3867_v17 = vcombine.low %v5136_v27, %v5139_v56  ;;  %v5607_v50 = vcombine.high %v4842_v10, %v4796_v43  ;;  %v5608_v0 = vcombine.low %v4811_v26, %v4814_v28  ;;  %3991 = vrot.lane.b32.xlu1 %v3916_v32, %s4484_s15  ;;  %v3782_v20 = vcombine.high %v3730_v58, %v3762_v25 }
 0x1d9   : > { %v3899_v45 = vcombine.low %v5142_v36, %v5145_v31  ;;  %v5609_v39 = vcombine.high %v4811_v26, %v4814_v28  ;;  %v5610_v43 = vcombine.low %v4817_v47, %v4820_v2  ;;  %v3731_v37 = vcombine.low %v3666_v16, %v3682_v59 }
 0x1da   : > { %v5160_v29 = vrot.slane %v5607_v50, %v4630_v24  ;;  %v1697_v41 = vrot.slane %v5608_v0, %v4624_v15  ;;  %v3763_v22 = vcombine.low %v3698_v53, %v3714_v57  ;;  %v5611_v33 = vcombine.high %v4817_v47, %v4820_v2  ;;  %4005 = vrot.lane.b32.xlu0 %v3782_v20, %s4486_s17 }
 0x1db   : > { %v1713_v30 = vrot.slane %v5609_v39, %v4624_v15  ;;  %v1729_v10 = vrot.slane %v5610_v43, %v4624_v15  ;;  %v5612_v55 = vcombine.low %v4845_v12, %v4848_v13  ;;  %v3917_v26 = vcombine.low %v3866_v42, %v3898_v1 }
 0x1dc   : > { %v1745_v54 = vrot.slane %v5611_v33, %v4624_v15  ;;  %v3732_v28 = vcombine.high %v3666_v16, %v3682_v59  ;;  %v3739_v25 = vrot.slane %v3731_v37, %v4630_v24  ;;  %v3771_v23 = vrot.slane %v3763_v22, %v4630_v24 }
 0x1dd   : > { %v1833_v58 = vrot.slane %v5612_v55, %v4624_v15  ;;  %v3875_v40 = vrot.slane %v3867_v17, %v4630_v24  ;;  %v3907_v34 = vrot.slane %v3899_v45, %v4630_v24  ;;  %v5613_v47 = vcombine.high %v4845_v12, %v4848_v13  ;;  %3999 = vrot.lane.b32.xlu1 %v3917_v26, %s4485_s16 }
 0x1de   : > { %v5614_v38 = vcombine.low %v4851_v14, %v4854_v51  ;;  %v5615_v60 = vcombine.high %v4851_v14, %v4854_v51  ;;  %v3764_v35 = vcombine.high %v3698_v53, %v3714_v57  ;;  %v5616_v32 = vcombine.low %v4760_v63, %v4772_v5 }
 0x1df   : > { %v1849_v2 = vrot.slane %v5613_v47, %v4624_v15  ;;  %v1002_v12 = vcombine.low %v4770_v4, %v4778_v9  ;;  %v3783_v13 = vcombine.low %v3739_v25, %v3771_v23  ;;  %v5617_v59 = vcombine.low %v4835_v48, %v4838_v49 }
 0x1e0   : > { %v1865_v61 = vrot.slane %v5614_v38, %v4624_v15  ;;  %v1881_v21 = vrot.slane %v5615_v60, %v4624_v15  ;;  %v5207_v16 = vrot.slane %v5616_v32, %v4624_v15  ;;  %v1003_v14 = vcombine.high %v4770_v4, %v4778_v9 }
 0x1e1   : > { %v5215_v17 = vrot.slane %v5617_v59, %v4624_v15  ;;  %v3918_v51 = vcombine.high %v3866_v42, %v3898_v1  ;;  %v3746_v53 = vrot.slane %v3732_v28, %v4630_v24  ;;  %v3868_v57 = vcombine.high %v5136_v27, %v5139_v56  ;;  %4013 = vrot.lane.b32.xlu0 %v3783_v13, %s4487_s22 }
 0x1e2   : > { %v3919_v50 = vcombine.low %v3875_v40, %v3907_v34  ;;  %v3900_v0 = vcombine.high %v5142_v36, %v5145_v31  ;;  %v1762_v20 = vcombine.low %v1697_v41, %v1713_v30  ;;  %v1794_v45 = vcombine.low %v1729_v10, %v1745_v54 }
 0x1e3   : > { %4007 = vrot.lane.b32.xlu1 %v3918_v51, %s4486_s17  ;;  %v3784_v39 = vcombine.high %v3739_v25, %v3771_v23  ;;  %v3778_v4 = vrot.slane %v3764_v35, %v4630_v24  ;;  %v1898_v9 = vcombine.low %v1833_v58, %v1849_v2  ;;  %v1930_v42 = vcombine.low %v1865_v61, %v1881_v21 }
 0x1e4   : > { %v5228_v1 = vrot.slane %v1762_v20, %v4630_v24  ;;  %v5231_v27 = vrot.slane %v1794_v45, %v4630_v24  ;;  %v1763_v56 = vcombine.high %v1697_v41, %v1713_v30  ;;  %v1795_v43 = vcombine.high %v1729_v10, %v1745_v54 }
 0x1e5   : > { %v5234_v37 = vrot.slane %v1898_v9, %v4630_v24  ;;  %v5237_v36 = vrot.slane %v1930_v42, %v4630_v24  ;;  %v3507_v31 = vcombine.low %v4936_v6, %v4946_v62  ;;  %v1899_v22 = vcombine.high %v1833_v58, %v1849_v2  ;;  %4021 = vrot.lane.b32.xlu0 %v3784_v39, %s4488_s23 }
 0x1e6   : > { %v1814_v33 = vcombine.low %v5228_v1, %v5231_v27  ;;  %v1815_v41 = vcombine.high %v5228_v1, %v5231_v27  ;;  %v5247_v30 = vrot.slane %v1763_v56, %v4630_v24  ;;  %v5250_v10 = vrot.slane %v1795_v43, %v4630_v24 }
 0x1e7   : > { %4015 = vrot.lane.b32.xlu1 %v3919_v50, %s4487_s22  ;;  %v1950_v54 = vcombine.low %v5234_v37, %v5237_v36  ;;  %v1951_v55 = vcombine.high %v5234_v37, %v5237_v36  ;;  %v5258_v58 = vrot.slane %v1899_v22, %v4630_v24  ;;  %v1931_v26 = vcombine.high %v1865_v61, %v1881_v21 }
 0x1e8   : > { %v3785_v28 = vcombine.low %v3746_v53, %v3778_v4  ;;  %v1816_v25 = vcombine.low %v5247_v30, %v5250_v10  ;;  %v1817_v23 = vcombine.high %v5247_v30, %v5250_v10  ;;  %v3643_v47 = vcombine.low %v4956_v18, %v4959_v19 }
 0x1e9   : > { %v3920_v2 = vcombine.high %v3875_v40, %v3907_v34  ;;  %v3882_v38 = vrot.slane %v3868_v57, %v4630_v24  ;;  %v3914_v60 = vrot.slane %v3900_v0, %v4630_v24  ;;  %v5269_v35 = vrot.slane %v1931_v26, %v4630_v24  ;;  %v5622_v26 = vld [vmem:[#allocation10_spill] sm:$0xff] }
 0x1ea   : > { %v4206_v61 = vcombine.low %v4897_v46, %v4900_v44  ;;  %v4208_v21 = vcombine.high %v4897_v46, %v4900_v44  ;;  %v4210_v32 = vcombine.low %v5130_v52, %v5160_v29  ;;  %v4212_v13 = vcombine.high %v5130_v52, %v5160_v29  ;;  %4029 = vrot.lane.b32.xlu0 %v3785_v28, %s4489_s24  ;;  %v5623_v28 = vld [vmem:[#allocation11_spill] sm:$0xff] }
 0x1eb   : > { %v1290_v40 = vcombine.low %v4768_v3, %v4776_v8  ;;  %4023 = vrot.lane.b32.xlu1 %v3920_v2, %s4488_s23  ;;  %v5618_v34 = vcombine.high %v4835_v48, %v4838_v49  ;;  %v1952_v46 = vcombine.low %v5258_v58, %v5269_v35  ;;  %v1953_v44 = vcombine.high %v5258_v58, %v5269_v35 }
 0x1ec   : > { %v5619_v52 = vcombine.high %v4760_v63, %v4772_v5  ;;  %v1010_v51 = vrot.slane %v1002_v12, %v4624_v15  ;;  %v1017_v57 = vrot.slane %v1003_v14, %v4624_v15  ;;  %v3786_v50 = vcombine.high %v3746_v53, %v3778_v4 }
 0x1ed   : > { %v5287_v59 = vrot.slane %v5618_v34, %v4624_v15  ;;  %v1291_v48 = vcombine.high %v4768_v3, %v4776_v8  ;;  %v1274_v49 = vcombine.low %v4774_v7, %v4780_v11  ;;  %v1275_v0 = vcombine.high %v4774_v7, %v4780_v11  ;;  %v5620_v7 = vld [vmem:[#allocation17_spill] sm:$0xff]  ;;  %v5621_v11 = vld [vmem:[#allocation16_spill] sm:$0xff] }
 0x1ee   : > { %v1033_v29 = vrot.slane %v5619_v52, %v4624_v15  ;;  %v3921_v20 = vcombine.low %v3882_v38, %v3914_v60  ;;  %4037 = vrot.lane.b32.xlu0 %v3786_v50, %s4490_s25  ;;  %v5307_v63 = vrot.slane %v4206_v61, %v4624_v15  ;;  %v5310_v5 = vrot.slane %v4208_v21, %v4624_v15 }
 0x1ef   : > { %v5313_v12 = vrot.slane %v4210_v32, %v4624_v15  ;;  %v5316_v3 = vrot.slane %v4212_v13, %v4624_v15  ;;  %v1298_v8 = vrot.slane %v1290_v40, %v4624_v15  ;;  %v1490_v14 = vcombine.low %v5621_v11, %v5620_v7 }
 0x1f0   : > { %4031 = vrot.lane.b32.xlu1 %v3921_v20, %s4489_s24  ;;  %v1522_v53 = vcombine.low %v5215_v17, %v5287_v59  ;;  %v1066_v45 = vcombine.low %v1010_v51, %v5207_v16  ;;  %v1067_v39 = vcombine.high %v1010_v51, %v5207_v16  ;;  %v1082_v4 = vcombine.low %v1017_v57, %v1033_v29 }
 0x1f1   : > { %v1083_v9 = vcombine.high %v1017_v57, %v1033_v29  ;;  %v1305_v42 = vrot.slane %v1291_v48, %v4624_v15  ;;  %v1282_v56 = vrot.slane %v1274_v49, %v4624_v15  ;;  %v1289_v43 = vrot.slane %v1275_v0, %v4624_v15  ;;  %v5626_v49 = vld [vmem:[#allocation14_spill] sm:$0xff]  ;;  %v5627_v0 = vld [vmem:[#allocation15_spill] sm:$0xff] }
 0x1f2   : > { %v3922_v22 = vcombine.high %v3882_v38, %v3914_v60  ;;  %v5624_v2 = vcombine.low %v5622_v26, %v5623_v28  ;;  %v1626_v61 = vcombine.low %v5307_v63, %v5310_v5  ;;  %v1658_v16 = vcombine.low %v5313_v12, %v5316_v3 }
 0x1f3   : > { %v1498_v21 = vrot.slane %v1490_v14, %v4630_v24  ;;  %v1530_v32 = vrot.slane %v1522_v53, %v4630_v24  ;;  %v1074_v13 = vrot.slane %v1066_v45, %v4630_v24  ;;  %v1081_v38 = vrot.slane %v1067_v39, %v4630_v24 }
 0x1f4   : > { %1964 = vrot.lane.b32.xlu0 %v5624_v2, %s4478_s29  ;;  %4039 = vrot.lane.b32.xlu1 %v3922_v22, %s4490_s25  ;;  %v1090_v60 = vrot.slane %v1082_v4, %v4630_v24  ;;  %v1097_v40 = vrot.slane %v1083_v9, %v4630_v24  ;;  %v1338_v34 = vcombine.low %v1282_v56, %v1298_v8 }
 0x1f5   : > { %v1339_v52 = vcombine.high %v1282_v56, %v1298_v8  ;;  %v1354_v29 = vcombine.low %v1289_v43, %v1305_v42  ;;  %v1355_v51 = vcombine.high %v1289_v43, %v1305_v42  ;;  %v5625_v57 = vcombine.high %v5622_v26, %v5623_v28 }
 0x1f6   : > { %v1634_v50 = vrot.slane %v1626_v61, %v4630_v24  ;;  %v1666_v48 = vrot.slane %v1658_v16, %v4630_v24  ;;  %v5628_v20 = vcombine.low %v5626_v49, %v5627_v0  ;;  %v1542_v14 = vcombine.low %v1498_v21, %v1530_v32 }
 0x1f7   : > { %v1491_v8 = vcombine.high %v5621_v11, %v5620_v7  ;;  %v1523_v53 = vcombine.high %v5215_v17, %v5287_v59  ;;  %v4213_v45 = vcombine.low %v1074_v13, %v1081_v38  ;;  %v4215_v39 = vcombine.high %v1074_v13, %v1081_v38 }
 0x1f8   : > { %1972 = vrot.lane.b32.xlu0 %v5625_v57, %s4477_s27  ;;  %1966 = vrot.lane.b32.xlu1 %v5628_v20, %s4478_s29  ;;  %v4217_v4 = vcombine.low %v1090_v60, %v1097_v40  ;;  %v4219_v9 = vcombine.high %v1090_v60, %v1097_v40  ;;  %v1346_v42 = vrot.slane %v1338_v34, %v4630_v24 }
 0x1f9   : > { %v1353_v56 = vrot.slane %v1339_v52, %v4630_v24  ;;  %v1362_v43 = vrot.slane %v1354_v29, %v4630_v24  ;;  %v1369_v22 = vrot.slane %v1355_v51, %v4630_v24  ;;  %v1543_v26 = vcombine.high %v1498_v21, %v1530_v32 }
 0x1fa   : > { %v1678_v28 = vcombine.low %v1634_v50, %v1666_v48  ;;  %v5629_v17 = vcombine.high %v5626_v49, %v5627_v0  ;;  %v1505_v59 = vrot.slane %v1491_v8, %v4630_v24  ;;  %v1537_v7 = vrot.slane %v1523_v53, %v4630_v24 }
 0x1fb   : > { %v1627_v11 = vcombine.high %v5307_v63, %v5310_v5  ;;  %v1659_v2 = vcombine.high %v5313_v12, %v5316_v3  ;;  %v1690_v61 = vrot.slane %v4213_v45, %v4624_v15  ;;  %v1706_v16 = vrot.slane %v4215_v39, %v4624_v15 }
 0x1fc   : > { %1980 = vrot.lane.b32.xlu0 %v1542_v14, %s4479_s30  ;;  %1974 = vrot.lane.b32.xlu1 %v5629_v17, %s4477_s27  ;;  %v1722_v21 = vrot.slane %v4217_v4, %v4624_v15  ;;  %v1738_v32 = vrot.slane %v4219_v9, %v4624_v15  ;;  %v4221_v13 = vcombine.low %v1346_v42, %v1353_v56  ;;  %s4100_s27 = sshll.u32 %s152_s4, 4  ;;  %s5523_s27 = int_to_ptr.vmem [resolvable:$true] %s4100_s27 }
 0x1fd   : > { %v4223_v38 = vcombine.high %v1346_v42, %v1353_v56  ;;  %v4225_v60 = vcombine.low %v1362_v43, %v1369_v22  ;;  %v4227_v40 = vcombine.high %v1362_v43, %v1369_v22  ;;  %v1544_v63 = vcombine.low %v1505_v59, %v1537_v7 }
 0x1fe   : > { %v1679_v5 = vcombine.high %v1634_v50, %v1666_v48  ;;  %v1641_v12 = vrot.slane %v1627_v11, %v4630_v24  ;;  %v1673_v3 = vrot.slane %v1659_v2, %v4630_v24  ;;  %v1746_v34 = vcombine.low %v1690_v61, %v1706_v16 }
 0x1ff   : > { %v1778_v52 = vcombine.low %v1722_v21, %v1738_v32  ;;  %v1826_v29 = vrot.slane %v4221_v13, %v4624_v15  ;;  %v1842_v51 = vrot.slane %v4223_v38, %v4624_v15  ;;  %v1858_v57 = vrot.slane %v4225_v60, %v4624_v15 }
 0x200   : > { %1988 = vrot.lane.b32.xlu0 %v1543_v26, %s4480_s2  ;;  %1982 = vrot.lane.b32.xlu1 %v1678_v28, %s4479_s30  ;;  %v1874_v49 = vrot.slane %v4227_v40, %v4624_v15  ;;  %v1545_v0 = vcombine.high %v1505_v59, %v1537_v7  ;;  %v1754_v50 = vrot.slane %v1746_v34, %v4630_v24 }
 0x201   : > { %v1786_v48 = vrot.slane %v1778_v52, %v4630_v24  ;;  %v1680_v20 = vcombine.low %v1641_v12, %v1673_v3  ;;  %v1882_v14 = vcombine.low %v1826_v29, %v1842_v51  ;;  %v1747_v45 = vcombine.high %v1690_v61, %v1706_v16 }
 0x202   : > { %v1914_v8 = vcombine.low %v1858_v57, %v1874_v49  ;;  %v1779_v39 = vcombine.high %v1722_v21, %v1738_v32  ;;  %v1681_v15 = vcombine.high %v1641_v12, %v1673_v3  ;;  %v1883_v26 = vcombine.high %v1826_v29, %v1842_v51  ;;  %v5410_v21 = vpop.permute.xlu1 %1958 }
 0x203   : > { %v1810_v53 = vcombine.low %v1754_v50, %v1786_v48  ;;  %v1890_v4 = vrot.slane %v1882_v14, %v4630_v24  ;;  %v1811_v42 = vcombine.high %v1754_v50, %v1786_v48  ;;  %v1761_v56 = vrot.slane %v1747_v45, %v4630_v24 }
 0x204   : > { %1996 = vrot.lane.b32.xlu0 %v1544_v63, %s4481_s5  ;;  %1990 = vrot.lane.b32.xlu1 %v1679_v5, %s4480_s2  ;;  %v1922_v9 = vrot.slane %v1914_v8, %v4630_v24  ;;  %v1793_v43 = vrot.slane %v1779_v39, %v4630_v24  ;;  %v1915_v28 = vcombine.high %v1858_v57, %v1874_v49 }
 0x205   : > { %v1897_v7 = vrot.slane %v1883_v26, %v4630_v24 }
 0x206   : > { %v1946_v22 = vcombine.low %v1890_v4, %v1922_v9  ;;  %v1812_v17 = vcombine.low %v1761_v56, %v1793_v43  ;;  %v1947_v59 = vcombine.high %v1890_v4, %v1922_v9  ;;  %v1929_v11 = vrot.slane %v1915_v28, %v4630_v24 }
 0x207   : > { %v1813_v2 = vcombine.high %v1761_v56, %v1793_v43 }
 0x208   : > { %2004 = vrot.lane.b32.xlu0 %v1545_v0, %s4482_s12  ;;  %1998 = vrot.lane.b32.xlu1 %v1680_v20, %s4481_s5  ;;  %v1948_v61 = vcombine.low %v1897_v7, %v1929_v11  ;;  %v1949_v16 = vcombine.high %v1897_v7, %v1929_v11  ;;  %s5521_s5 = scalar_lea.hbm %s5574_s1, %s4271_s18 }
 0x20c   : > { %2012 = vrot.lane.b32.xlu0 %v1810_v53, %s4483_s13  ;;  %2006 = vrot.lane.b32.xlu1 %v1681_v15, %s4482_s12  ;;  %s4085_s12 = scalar_lea.sflag [#allocation4], %s4616_s26 }
 0x210   : > { %2020 = vrot.lane.b32.xlu0 %v1811_v42, %s4484_s15  ;;  %2014 = vrot.lane.b32.xlu1 %v1946_v22, %s4483_s13  ;;  %s4386_s13 = scalar_lea.vmem %s5523_s27, 256 }
 0x211   : > { %p4387_p8 = scmp.ne.s32.totalorder %s5523_s27, %s4386_s13 }
 0x213   : > { %p4388_p11 = pnand %p4387_p8, %p5636_p9 }
 0x214   : > { %2028 = vrot.lane.b32.xlu0 %v1812_v17, %s4485_s16  ;;  %2022 = vrot.lane.b32.xlu1 %v1947_v59, %s4484_s15  ;;  %s4390_s15 = sshll.u32 %s4492_s9, 4  ;;  %s4391_s15 = int_to_ptr.vmem [resolvable:$false] %s4390_s15 }
 0x215   : > { %p4389_p0 = pneg %p4388_p11  ;;  %p4393_p6 = scmp.lt.s32.totalorder %s5523_s27, %s4391_s15 }
 0x218   : > { %2036 = vrot.lane.b32.xlu0 %v1813_v2, %s4486_s17  ;;  %2030 = vrot.lane.b32.xlu1 %v1948_v61, %s4485_s16  ;;  %s4392_s16 = scalar_lea.vmem %s4391_s15, 512 }
 0x219   : > { %p4394_p13 = scmp.lt.s32.totalorder %s4392_s16, %s4386_s13 }
 0x21b   : > { %p4395_p2 = por %p4394_p13, %p4393_p6 }
 0x21c   : > { %2044 = vrot.lane.b32.xlu0 %v1814_v33, %s4487_s22  ;;  %2038 = vrot.lane.b32.xlu1 %v1949_v16, %s4486_s17  ;;  %v5428_v33 = vpop.permute.xlu0 %1956 }
 0x21d   : > { %p4396_p5 = pnand %p4395_p2, %p4389_p0 }
 0x21f   : > { %v3928_v24 = vpop.permute.xlu1 %3927 }
 0x220   : > { %2052 = vrot.lane.b32.xlu0 %v1815_v41, %s4488_s23  ;;  %2046 = vrot.lane.b32.xlu1 %v1950_v54, %s4487_s22  ;;  %v3926_v27 = vpop.permute.xlu0 %3925  ;;  %v4044_v6 = vsel %vm2074_vm1, %v3643_v47, %v3928_v24 }
 0x221   : > { %v4043_v58 = vsel %vm2074_vm1, %v3507_v31, %v3926_v27 }
 0x223   : > { %v3934_v1 = vpop.permute.xlu1 %3933 }
 0x224   : > { %2060 = vrot.lane.b32.xlu0 %v1816_v25, %s4489_s24  ;;  %2054 = vrot.lane.b32.xlu1 %v1951_v55, %s4488_s23  ;;  %v3942_v37 = vpop.permute.xlu0 %3941 }
 0x227   : > { %v3936_v41 = vpop.permute.xlu1 %3935 }
 0x228   : > { %2068 = vrot.lane.b32.xlu0 %v1817_v23, %s4490_s25  ;;  %2062 = vrot.lane.b32.xlu1 %v1952_v46, %s4489_s24  ;;  %v4046_v51 = vsel %vm2077_vm0, %v4044_v6, %v3936_v41  ;;  %v5634_v6 = vld [vmem:[#allocation13_spill] sm:$0xff] }
 0x22b   : > { %v3944_v36 = vpop.permute.xlu1 %3943 }
 0x22c   : > { %2070 = vrot.lane.b32.xlu1 %v1953_v44, %s4490_s25  ;;  %v4045_v44 = vsel %vm2077_vm0, %v4043_v58, %v3934_v1  ;;  %v4048_v0 = vsel %vm2080_vm2, %v4046_v51, %v3944_v36 }
 0x22d   : > { %v4047_v3 = vsel %vm2080_vm2, %v4045_v44, %v3942_v37 }
 0x22f   : > { %v3950_v54 = vpop.permute.xlu0 %3949 }
 0x230   : > { %v4049_v52 = vsel %vm2083_vm3, %v4047_v3, %v3950_v54 }
 0x231   : > { %v3952_v55 = vpop.permute.xlu1 %3951 }
 0x232   : > { %v4050_v48 = vsel %vm2083_vm3, %v4048_v0, %v3952_v55 }
 0x233   : > { %v3958_v25 = vpop.permute.xlu0 %3957 }
 0x234   : > { %v4051_v29 = vsel %vm2086_vm4, %v4049_v52, %v3958_v25 }
 0x235   : > { %v3960_v30 = vpop.permute.xlu1 %3959 }
 0x236   : > { %v4052_v19 = vsel %vm2086_vm4, %v4050_v48, %v3960_v30 }
 0x237   : > { %v3966_v10 = vpop.permute.xlu0 %3965 }
 0x238   : > { %v4053_v62 = vsel %vm2089_vm5, %v4051_v29, %v3966_v10  ;;  %v5633_v29 = vld [vmem:[#allocation12_spill] sm:$0xff] }
 0x23b   : > { %v3974_v23 = vpop.permute.xlu0 %3973 }
 0x23c   : > { %v3968_v32 = vpop.permute.xlu1 %3967  ;;  %v4055_v57 = vsel %vm2092_vm6, %v4053_v62, %v3974_v23  ;;  %v5635_v62 = vcombine.low %v5633_v29, %v5634_v6 }
 0x23d   : > { %v4054_v14 = vsel %vm2089_vm5, %v4052_v19, %v3968_v32 }
 0x23f   : > { %v3982_v13 = vpop.permute.xlu0 %3981 }
 0x240   : > { %v3976_v38 = vpop.permute.xlu1 %3975  ;;  %v4057_v50 = vsel %vm2095_vm7, %v4055_v57, %v3982_v13 }
 0x241   : > { %v4056_v45 = vsel %vm2092_vm6, %v4054_v14, %v3976_v38 }
 0x243   : > { %v3990_v60 = vpop.permute.xlu0 %3989 }
 0x244   : > { %v4059_v18 = vsel %vm2098_vm8, %v4057_v50, %v3990_v60 }
 0x246   : > { %v3984_v46 = vpop.permute.xlu1 %3983 }
 0x247   : > { %v4058_v15 = vsel %vm2095_vm7, %v4056_v45, %v3984_v46 }
 0x248   : > { %v3998_v40 = vpop.permute.xlu0 %3997 }
 0x249   : > { %v4061_v47 = vsel %vm2101_vm9, %v4059_v18, %v3998_v40  ;;  %v5630_v40 = vld [vmem:[#allocation8_spill] sm:$0xff] }
 0x24a   : > { %v3992_v63 = vpop.permute.xlu1 %3991 }
 0x24b   : > { %v4060_v9 = vsel %vm2098_vm8, %v4058_v15, %v3992_v63  ;;  %v5631_v63 = vld [vmem:[#allocation9_spill] sm:$0xff] }
 0x24c   : > { %v4006_v5 = vpop.permute.xlu0 %4005 }
 0x24d   : > { %v4063_v8 = vsel %vm2104_vm10, %v4061_v47, %v4006_v5  ;;  %v5632_v5 = vcombine.low %v5630_v40, %v5631_v63 }
 0x24f   : > { %v4000_v35 = vpop.permute.xlu1 %3999  ;;  %v2075_v58 = vsel %vm2074_vm1, %v5632_v5, %v5428_v33 }
 0x250   : > { %v4062_v43 = vsel %vm2101_vm9, %v4060_v9, %v4000_v35 }
 0x253   : > { %v4014_v12 = vpop.permute.xlu0 %4013 }
 0x254   : > { %v4065_v39 = vsel %vm2107_vm11, %v4063_v8, %v4014_v12 }
 0x255   : > { %v4008_v34 = vpop.permute.xlu1 %4007 }
 0x256   : > { %v4064_v28 = vsel %vm2104_vm10, %v4062_v43, %v4008_v34 }
 0x257   : > { %v4022_v31 = vpop.permute.xlu0 %4021 }
 0x258   : > { %v4067_v4 = vsel %vm2110_vm12, %v4065_v39, %v4022_v31  ;;  %v2076_v31 = vsel %vm2074_vm1, %v5635_v62, %v5410_v21 }
 0x259   : > { %v4016_v49 = vpop.permute.xlu1 %4015 }
 0x25a   : > { %v4066_v17 = vsel %vm2107_vm11, %v4064_v28, %v4016_v49 }
 0x25c   : > { %v4030_v20 = vpop.permute.xlu0 %4029 }
 0x25d   : > { %v4024_v53 = vpop.permute.xlu1 %4023  ;;  %v4069_v42 = vsel %vm2113_vm13, %v4067_v4, %v4030_v20 }
 0x25e   : > { %v4068_v59 = vsel %vm2110_vm12, %v4066_v17, %v4024_v53 }
 0x260   : > { %v4038_v56 = vpop.permute.xlu0 %4037 }
 0x261   : > { %v4071_v26 = vsel %vm2116_vm14, %v4069_v42, %v4038_v56 }
 0x262   : > { %v4032_v22 = vpop.permute.xlu1 %4031  ;;  %4075 = vrot.lane.b32.xlu0 %v4071_v26, %s4491_s28 }
 0x263   : > { %v4070_v11 = vsel %vm2113_vm13, %v4068_v59, %v4032_v22 }
 0x266   : > { %v1965_v7 = vpop.permute.xlu0 %1964  ;;  %v4040_v2 = vpop.permute.xlu1 %4039 }
 0x267   : > { %v4072_v61 = vsel %vm2116_vm14, %v4070_v11, %v4040_v2  ;;  %v2078_v35 = vsel %vm2077_vm0, %v2075_v58, %v1965_v7 }
 0x268   : > { %4077 = vrot.lane.b32.xlu1 %v4072_v61, %s4491_s28 }
 0x26a   : > { %v1973_v16 = vpop.permute.xlu0 %1972  ;;  %v1967_v24 = vpop.permute.xlu1 %1966 }
 0x26b   : > { %v2081_v12 = vsel %vm2080_vm2, %v2078_v35, %v1973_v16  ;;  %v2079_v57 = vsel %vm2077_vm0, %v2076_v31, %v1967_v24  ;;  %vm4081_vm0 = vcmask 523520  }
 0x26e   : > { %v1981_v1 = vpop.permute.xlu0 %1980  ;;  %v1975_v27 = vpop.permute.xlu1 %1974 }
 0x26f   : > { %v2084_v34 = vsel %vm2083_vm3, %v2081_v12, %v1981_v1  ;;  %v2082_v50 = vsel %vm2080_vm2, %v2079_v57, %v1975_v27 }
 0x272   : > { %v1989_v41 = vpop.permute.xlu0 %1988  ;;  %v1983_v37 = vpop.permute.xlu1 %1982 }
 0x273   : > { %v2087_v52 = vsel %vm2086_vm4, %v2084_v34, %v1989_v41  ;;  %v2085_v18 = vsel %vm2083_vm3, %v2082_v50, %v1983_v37 }
 0x276   : > { %v1997_v36 = vpop.permute.xlu0 %1996  ;;  %v1991_v54 = vpop.permute.xlu1 %1990 }
 0x277   : > { %v2090_v51 = vsel %vm2089_vm5, %v2087_v52, %v1997_v36  ;;  %v2088_v47 = vsel %vm2086_vm4, %v2085_v18, %v1991_v54 }
 0x27a   : > { %v2005_v55 = vpop.permute.xlu0 %2004  ;;  %v1999_v25 = vpop.permute.xlu1 %1998 }
 0x27b   : > { %v2093_v49 = vsel %vm2092_vm6, %v2090_v51, %v2005_v55  ;;  %v2091_v14 = vsel %vm2089_vm5, %v2088_v47, %v1999_v25 }
 0x27e   : > { %v2013_v30 = vpop.permute.xlu0 %2012  ;;  %v2007_v10 = vpop.permute.xlu1 %2006 }
 0x27f   : > { %v2096_v48 = vsel %vm2095_vm7, %v2093_v49, %v2013_v30  ;;  %v2094_v45 = vsel %vm2092_vm6, %v2091_v14, %v2007_v10 }
 0x282   : > { %v2021_v23 = vpop.permute.xlu0 %2020  ;;  %v2015_v32 = vpop.permute.xlu1 %2014 }
 0x283   : > { %v2099_v19 = vsel %vm2098_vm8, %v2096_v48, %v2021_v23  ;;  %v2097_v15 = vsel %vm2095_vm7, %v2094_v45, %v2015_v32 }
 0x286   : > { %v2029_v13 = vpop.permute.xlu0 %2028  ;;  %v2023_v38 = vpop.permute.xlu1 %2022 }
 0x287   : > { %v2102_v21 = vsel %vm2101_vm9, %v2099_v19, %v2029_v13  ;;  %v2100_v9 = vsel %vm2098_vm8, %v2097_v15, %v2023_v38 }
 0x28a   : > { %v2037_v60 = vpop.permute.xlu0 %2036  ;;  %v2031_v46 = vpop.permute.xlu1 %2030 }
 0x28b   : > { %v2105_v8 = vsel %vm2104_vm10, %v2102_v21, %v2037_v60  ;;  %v2103_v43 = vsel %vm2101_vm9, %v2100_v9, %v2031_v46 }
 0x28e   : > { %v2045_v44 = vpop.permute.xlu0 %2044  ;;  %v2039_v3 = vpop.permute.xlu1 %2038 }
 0x28f   : > { %v2108_v39 = vsel %vm2107_vm11, %v2105_v8, %v2045_v44  ;;  %v2106_v28 = vsel %vm2104_vm10, %v2103_v43, %v2039_v3 }
 0x292   : > { %v2053_v33 = vpop.permute.xlu0 %2052  ;;  %v2047_v0 = vpop.permute.xlu1 %2046 }
 0x293   : > { %v2111_v4 = vsel %vm2110_vm12, %v2108_v39, %v2053_v33  ;;  %v2109_v17 = vsel %vm2107_vm11, %v2106_v28, %v2047_v0 }
 0x296   : > { %v2061_v20 = vpop.permute.xlu0 %2060  ;;  %v2055_v53 = vpop.permute.xlu1 %2054 }
 0x297   : > { %v2114_v42 = vsel %vm2113_vm13, %v2111_v4, %v2061_v20  ;;  %v2112_v59 = vsel %vm2110_vm12, %v2109_v17, %v2055_v53 }
 0x29a   : > { %v2069_v56 = vpop.permute.xlu0 %2068  ;;  %v2063_v22 = vpop.permute.xlu1 %2062 }
 0x29b   : > { %v2117_v26 = vsel %vm2116_vm14, %v2114_v42, %v2069_v56  ;;  %v2115_v7 = vsel %vm2113_vm13, %v2112_v59, %v2063_v22 }
 0x29c   : > { %2120 = vst.msk [vmem:[%s152_s4] sm:$0xff] %vm2119_vm15, %v2117_v26 }
 0x29e   : > { %v2071_v11 = vpop.permute.xlu1 %2070 }
 0x29f   : > { %v2118_v2 = vsel %vm2116_vm14, %v2115_v7, %v2071_v11 }
 0x2a0   : > { %2121 = vst.msk [vmem:[%s152_s4 + $0x8] sm:$0xff] %vm2119_vm15, %v2118_v2 }
 0x2d4   : > { %v4076_v61 = vpop.permute.xlu0 %4075 }
 0x2d5   : > { %4082 = vst.msk [vmem:[%s152_s4] sm:$0xff] %vm4081_vm0, %v4076_v61 }
 0x2da   : > { %v4078_v16 = vpop.permute.xlu1 %4077 }
 0x2db   : > { %4083 = vst.msk [vmem:[%s152_s4 + $0x8] sm:$0xff] %vm4081_vm0, %v4078_v16 }
 0x2dc   : > { %4399 = shalt.err (!%p4396_p5)
}
 0x2dd   : > { %s4400_s17 = scalar_lea.hbm %s5521_s5, 256  ;;  %s4404_s24 = scalar_lea.hbm %s5574_s1, 512 }
 0x2de   : > { %p4401_p4 = scmp.ne.s32.totalorder %s5521_s5, %s4400_s17  ;;  %p4405_p12 = scmp.lt.u32.totalorder %s5521_s5, %s5574_s1 }
 0x2df   : > { %p4406_p1 = scmp.lt.u32.totalorder %s4404_s24, %s4400_s17  ;;  %p4408_p8 = scmp.lt.u32.totalorder %s4400_s17, %s5521_s5 }
 0x2e0   : > { %p4402_p7 = pnand %p4401_p4, %p5636_p9 }
 0x2e1   : > { %p4407_p3 = por %p4406_p1, %p4405_p12 }
 0x2e2   : > { %p4403_p10 = pneg %p4402_p7 }
 0x2e3   : > { %p4409_p11 = por %p4408_p8, %p4407_p3 }
 0x2e5   : > { %p4410_p0 = pnand %p4409_p11, %p4403_p10 }
 0x2e7   : > { %4413 = shalt.err (!%p4410_p0)
}
 0x2e8   : > { %s4493_s3 = smov 128  }
 0x2e9   : > { %4274 = dma.vmem_to_hbm [thread:$0]  (%p5636_p9), %s5523_s27, 256, %s5521_s5, %s4085_s12, %s4493_s3, %s4493_s3, %s4479_s30  }
 0x2ea PF: > { %s4115_s4 = sand.u32 1, %s4448_s6   ;;  %p5637_p6 = scmp.ne.s32.totalorder %s5593_s21, 0 }
 0x2eb   : > { %p5638_p13 = scmp.ge.s32.totalorder %s4468_s11, 2  ;;  %s4116_s18 = scalar_lea.sflag [#allocation4], %s4115_s4 }
 0x2ed   : > { %p4281_p2 = pnand %p5638_p13, %p5637_p6 }
 0x2ef   : > { %4443 = dma.done.wait (!%p4281_p2), %s4116_s18, 256  }
 0x2f0   : > { %4445 = vsyncadd (!%p4281_p2), %s4116_s18, 4294967040  ;;  %s17_s11 = sadd.s32 1, %s4468_s11   ;;  %s5639_s6 = smov %s4452_s7 }
 0x2f1   : > { %p14_p5 = scmp.ge.s32.totalorder %s17_s11, 4   ;;  %s5640_s7 = smov %s4456_s8 }
 0x2f2   : > { %s5641_s8 = smov %s4560_s20  ;;  %s5642_s9 = smov %s4464_s10 }
 0x2f3   : > { %s5643_s10 = smov %s5645_s14  ;;  %16 = sbr.rel (!%p14_p5) target bundleno = 6 (0x6), region = 70 }
 0x2fa   :  { %4121 = vsyncpa [#allocation3], 1 }
 0x2fb   :  { %4123 = vsyncpa [#allocation3 + $0x1], 1 }
 0x2fc   :  { %4124 = vsyncpa [#allocation4], 1 }
 0x2fd   :  { %4126 = vsyncpa [#allocation4 + $0x1], 1 }

</bundles_post_ra>
